<compile_context>
chip_gen: v6e
topology: v6e:2x2x1
jax: 0.10.0
libtpu: 0.0.40
codegen_flags: <defaults>
</compile_context>

<pallas_src>
import functools

import jax
import jax.numpy as jnp
from jax.experimental import pallas as pl
from jax.experimental.pallas import tpu as pltpu


def _round_up(x, m):
    return ((x + m - 1) // m) * m


# --------------------------------------------------------------------------- #
# LSTM layer kernel.
#   grid = (batch tiles ["parallel"], time blocks ["arbitrary"]).
#   x_ref is a per-batch-tile, flat time-major slab: row index = t * BT + b.
# --------------------------------------------------------------------------- #
def _lstm_kernel(x_ref, len_ref, wih_ref, whh_ref, b_ref,
                 out_ref, hlast_ref,
                 h_scr, c_scr, gx_scr, *, time_block, batch_tile, norm_last):
    tb = pl.program_id(1)                    # time-block index (sequential / inner)
    TB = time_block
    BT = batch_tile
    H = h_scr.shape[1]

    @pl.when(tb == 0)
    def _():                                 # fresh state for every batch tile
        h_scr[...] = jnp.zeros_like(h_scr)
        c_scr[...] = jnp.zeros_like(c_scr)

    # Hoisted, time-invariant input projection for the whole time block:
    # one (TB*BT, D) x (D, 4H) bf16 MXU call (f32 accumulate), with the per-row
    # gate bias folded in here so it is off the per-step serial dependency chain.
    gx_scr[...] = (jnp.dot(x_ref[...], wih_ref[...],
                           preferred_element_type=jnp.float32)
                   + jnp.tile(b_ref[...], (TB, 1)))

    lengths = len_ref[...]                   # (BT, 1) int32 — in-kernel mask source
    t0 = tb * TB

    h = h_scr[...]
    c = c_scr[...]
    for tt in range(TB):                     # static unroll of the recurrence
        gates = (gx_scr[pl.ds(tt * BT, BT), :]
                 + jnp.dot(h.astype(jnp.bfloat16), whh_ref[...],
                           preferred_element_type=jnp.float32))
        # PyTorch gate order: i, f, g, o
        i_g = jax.nn.sigmoid(gates[:, 0:H])
        f_g = jax.nn.sigmoid(gates[:, H:2 * H])
        g_g = jnp.tanh(gates[:, 2 * H:3 * H])
        o_g = jax.nn.sigmoid(gates[:, 3 * H:4 * H])
        c_new = f_g * c + i_g * g_g
        h_new = o_g * jnp.tanh(c_new)
        valid = (t0 + tt) < lengths          # (BT, 1) bool
        h = jnp.where(valid, h_new, h)       # freeze state past each sequence length
        c = jnp.where(valid, c_new, c)
        out_ref[pl.ds(tt * BT, BT), :] = jnp.where(valid, h_new, 0.0)
    h_scr[...] = h
    c_scr[...] = c

    # h_last written only once per batch tile, on the final time block.
    @pl.when(tb == pl.num_programs(1) - 1)
    def _():
        if norm_last:                        # fused l2-normalize (encoder tail)
            # NOTE: matches torch.div exactly (no eps) — zero-length rows yield NaN
            # but they are padding rows and sliced off in the wrapper.
            norm = jnp.sqrt(jnp.sum(h * h, axis=1, keepdims=True))
            hlast_ref[...] = h / norm
        else:
            hlast_ref[...] = h


def lstm_layer(x_tbd, lengths, wih_t, whh_t, bias_b4h, *,
               time_block=32, batch_tile=128, norm_last=False):
    """x_tbd: (T, B, D) time-major.  lengths: (B,) int.  bias_b4h: (B, 4H) f32.
    wih_t: (D', 4H) bf16 (D' >= D, zero-padded rows).  whh_t: (H, 4H) bf16.

    Returns (out (T, B, H) f32, h_last (B, H) f32).  Packed-sequence semantics:
    output is zero and state frozen for t >= lengths[b]."""
    T, B, D = x_tbd.shape
    H = whh_t.shape[0]
    D_pad = _round_up(D, 128)                          # lane-dense x / full-K MXU

    B8 = _round_up(B, 8)
    BT = min(batch_tile, B8)                           # batch tile (parallel grid axis)
    B_pad = _round_up(B8, BT)
    n_bt = B_pad // BT

    TB = min(time_block, _round_up(T, 8))              # time block (sequential axis)
    T_pad = _round_up(T, TB)

    x_p = jnp.pad(x_tbd.astype(jnp.bfloat16),
                  ((0, T_pad - T), (0, B_pad - B), (0, D_pad - D)))
    # per-batch-tile flat time-major rows: row = t * BT + (b within tile)
    x_tiles = (x_p.reshape(T_pad, n_bt, BT, D_pad)
               .transpose(1, 0, 2, 3)
               .reshape(n_bt, T_pad * BT, D_pad))

    wih_p = wih_t
    if wih_p.shape[0] != D_pad:                        # defensive (normally pre-padded)
        wih_p = jnp.pad(wih_p, ((0, D_pad - wih_p.shape[0]), (0, 0)))

    len_p = jnp.pad(lengths.astype(jnp.int32), (0, B_pad - B)).reshape(B_pad, 1)
    bias_p = jnp.pad(bias_b4h.astype(jnp.float32), ((0, B_pad - B), (0, 0)))

    out_tiles, h_last = pl.pallas_call(
        functools.partial(_lstm_kernel, time_block=TB, batch_tile=BT,
                          norm_last=norm_last),
        out_shape=(jax.ShapeDtypeStruct((n_bt, T_pad * BT, H), jnp.float32),
                   jax.ShapeDtypeStruct((B_pad, H), jnp.float32)),
        grid_spec=pltpu.PrefetchScalarGridSpec(
            num_scalar_prefetch=0,
            grid=(n_bt, T_pad // TB),
            in_specs=[
                pl.BlockSpec((None, TB * BT, D_pad), lambda bt, tb: (bt, tb, 0)),  # x
                pl.BlockSpec((BT, 1), lambda bt, tb: (bt, 0)),           # lengths
                pl.BlockSpec((D_pad, 4 * H), lambda bt, tb: (0, 0)),     # W_ih^T (resident)
                pl.BlockSpec((H, 4 * H), lambda bt, tb: (0, 0)),         # W_hh^T (resident)
                pl.BlockSpec((BT, 4 * H), lambda bt, tb: (bt, 0)),       # fused bias
            ],
            out_specs=[
                pl.BlockSpec((None, TB * BT, H), lambda bt, tb: (bt, tb, 0)),
                pl.BlockSpec((BT, H), lambda bt, tb: (bt, 0)),
            ],
            scratch_shapes=[pltpu.VMEM((BT, H), jnp.float32),                # h
                            pltpu.VMEM((BT, H), jnp.float32),                # c
                            pltpu.VMEM((TB * BT, 4 * H), jnp.float32)],      # hoisted gx
        ),
        compiler_params=pltpu.CompilerParams(
            dimension_semantics=("parallel", "arbitrary"),   # batch across TCs on v7x
            vmem_limit_bytes=64 * 1024 * 1024),
    )(x_tiles, len_p, wih_p, whh_t, bias_p)

    out = (out_tiles.reshape(n_bt, T_pad, BT, H)
           .transpose(1, 0, 2, 3)
           .reshape(T_pad, B_pad, H)[:T, :B])
    return out, h_last[:B]


# --------------------------------------------------------------------------- #
# Tiled vocab projection: (M, H) x (H, V) + b.
# Grid = (V tiles [outer], M tiles [inner]) so each (H, tv) weight tile is fetched
# once and reused across all M tiles; bf16 inputs, f32 accumulation.
# --------------------------------------------------------------------------- #
def _linear_kernel(x_ref, w_ref, b_ref, o_ref):
    o_ref[...] = (jnp.dot(x_ref[...], w_ref[...],
                          preferred_element_type=jnp.float32) + b_ref[...])


def linear_proj(x, w_t_pad, b_pad, tv, n_valid_cols, *, tm=512):
    """x: (M, H) f32.  w_t_pad: (H, V_pad) bf16, pre-transposed/padded at init.
    b_pad: (1, V_pad) f32."""
    M, H = x.shape
    V_pad = w_t_pad.shape[1]
    M8 = _round_up(M, 8)
    TM = min(tm, M8)
    M_pad = _round_up(M8, TM)
    x_p = jnp.pad(x.astype(jnp.bfloat16), ((0, M_pad - M), (0, 0)))

    out = pl.pallas_call(
        _linear_kernel,
        out_shape=jax.ShapeDtypeStruct((M_pad, V_pad), jnp.float32),
        grid_spec=pltpu.PrefetchScalarGridSpec(
            num_scalar_prefetch=0,
            grid=(V_pad // tv, M_pad // TM),                 # V outer -> W tile reused
            in_specs=[
                pl.BlockSpec((TM, H), lambda j, i: (i, 0)),
                pl.BlockSpec((H, tv), lambda j, i: (0, j)),
                pl.BlockSpec((1, tv), lambda j, i: (0, j)),
            ],
            out_specs=pl.BlockSpec((TM, tv), lambda j, i: (i, j)),
        ),
        compiler_params=pltpu.CompilerParams(
            dimension_semantics=("parallel", "parallel"),    # shards across TCs on v7x
            vmem_limit_bytes=32 * 1024 * 1024),
    )(x_p, w_t_pad, b_pad)
    return out[:M, :n_valid_cols]


# --------------------------------------------------------------------------- #
# Module (parameters + forward glue)
# --------------------------------------------------------------------------- #
class Seq2Seq2DecoderPallas:
    def __init__(self, emsize, nhidden, ntokens, nlayers, noise_r=0.2,
                 share_decoder_emb=False, hidden_init=False, key=None):
        self.emsize, self.nhidden, self.ntokens = emsize, nhidden, ntokens
        self.nlayers, self.noise_r, self.hidden_init = nlayers, noise_r, hidden_init
        initrange = 0.1
        key = key if key is not None else jax.random.PRNGKey(0)

        def uni(k, shape):
            return jax.random.uniform(k, shape, jnp.float32, -initrange, initrange)

        ks = iter(jax.random.split(key, 32))
        self.embedding = uni(next(ks), (ntokens, emsize))
        self.embedding_decoder1 = uni(next(ks), (ntokens, emsize))
        self.embedding_decoder2 = (self.embedding_decoder1 if share_decoder_emb
                                   else uni(next(ks), (ntokens, emsize)))

        def lstm_params(k, in_size):
            k1, k2, k3, k4 = jax.random.split(k, 4)
            return (uni(k1, (4 * nhidden, in_size)),    # weight_ih (PyTorch layout)
                    uni(k2, (4 * nhidden, nhidden)),    # weight_hh
                    uni(k3, (4 * nhidden,)),            # bias_ih
                    uni(k4, (4 * nhidden,)))            # bias_hh

        # raw (PyTorch-layout, f32) params kept for the reference check
        self.encoder_raw = [lstm_params(next(ks), emsize if l == 0 else nhidden)
                            for l in range(nlayers)]
        self.decoder1_raw = lstm_params(next(ks), emsize + nhidden)
        self.decoder2_raw = lstm_params(next(ks), emsize + nhidden)
        self.linear_w = uni(next(ks), (ntokens, nhidden))
        self.linear_b = jnp.zeros((ntokens,), jnp.float32)

        # --- kernel-side weights: pad D to 128, transpose, fuse biases, bf16 ------- #
        E_pad = _round_up(emsize, 128)
        self._E_pad = E_pad

        def pad_emb(w):                                    # (V, E) -> (V, E_pad) bf16
            return jnp.pad(w, ((0, 0), (0, E_pad - emsize))).astype(jnp.bfloat16)

        self.embedding_k = pad_emb(self.embedding)
        self.embedding_decoder1_k = pad_emb(self.embedding_decoder1)
        self.embedding_decoder2_k = (self.embedding_decoder1_k if share_decoder_emb
                                     else pad_emb(self.embedding_decoder2))

        def enc_kernel_params(p, in_size):
            w_ih, w_hh, b_ih, b_hh = p
            d_pad = _round_up(in_size, 128)
            wih_t = jnp.pad(jnp.transpose(w_ih), ((0, d_pad - in_size), (0, 0)))
            return dict(wih_t=wih_t.astype(jnp.bfloat16),            # (D_pad, 4H)
                        whh_t=jnp.transpose(w_hh).astype(jnp.bfloat16),  # (H, 4H)
                        bias=b_ih + b_hh)                             # (4H,) f32

        def dec_kernel_params(p):
            w_ih, w_hh, b_ih, b_hh = p
            wih_emb_t = jnp.pad(jnp.transpose(w_ih[:, :emsize]),
                                ((0, E_pad - emsize), (0, 0)))
            return dict(wih_emb_t=wih_emb_t.astype(jnp.bfloat16),     # (E_pad, 4H)
                        wih_hid_t=jnp.transpose(w_ih[:, emsize:]),    # (H, 4H) f32
                        whh_t=jnp.transpose(w_hh).astype(jnp.bfloat16),
                        bias=b_ih + b_hh)                             # (4H,) f32

        self.encoder_k = [enc_kernel_params(p, emsize if l == 0 else nhidden)
                          for l, p in enumerate(self.encoder_raw)]
        self.decoder1_k = dec_kernel_params(self.decoder1_raw)
        self.decoder2_k = dec_kernel_params(self.decoder2_raw)

        # vocab projection: transpose + pad + bf16 once
        tv = min(2048, _round_up(ntokens, 128))
        v_pad = _round_up(ntokens, tv)
        self._tv = tv
        self.linear_wT_pad = jnp.pad(jnp.transpose(self.linear_w),
                                     ((0, 0), (0, v_pad - ntokens))
                                     ).astype(jnp.bfloat16)            # (H, V_pad)
        self.linear_b_pad = jnp.pad(self.linear_b,
                                    (0, v_pad - ntokens)).reshape(1, v_pad)

    # ------------------------------------------------------------------ #
    def encode(self, indices, lengths, noise=False, noise_key=None):
        B, _ = indices.shape
        # gather embeddings directly time-major from the padded bf16 table
        x = jnp.take(self.embedding_k, jnp.transpose(indices), axis=0)   # (T, B, E_pad)
        h_last = None
        nlay = len(self.encoder_k)
        for li, lk in enumerate(self.encoder_k):
            bias_b = jnp.broadcast_to(lk["bias"][None, :], (B, 4 * self.nhidden))
            x, h_last = lstm_layer(x, lengths, lk["wih_t"], lk["whh_t"], bias_b,
                                   norm_last=(li == nlay - 1))   # l2-norm fused in tail
        hidden = h_last                                          # (B, H), normalized
        if noise and self.noise_r > 0:
            hidden = hidden + self.noise_r * jax.random.normal(
                noise_key, hidden.shape, hidden.dtype)
        return hidden

    def decode(self, whichdecoder, hidden, indices, lengths):
        B, T = indices.shape
        H, V = self.nhidden, self.ntokens
        if whichdecoder == 1:
            emb_w, dk = self.embedding_decoder1_k, self.decoder1_k
        else:
            emb_w, dk = self.embedding_decoder2_k, self.decoder2_k
        # Only the embedding half of the decoder input goes through the recurrence;
        # the time-invariant `hidden` contribution is folded into a per-row gate bias.
        x = jnp.take(emb_w, jnp.transpose(indices), axis=0)               # (T, B, E_pad)
        hid_gates = jnp.dot(hidden, dk["wih_hid_t"])                      # (B, 4H), once
        bias_b = dk["bias"][None, :] + hid_gates
        out, _ = lstm_layer(x, lengths, dk["wih_emb_t"], dk["whh_t"], bias_b)  # (T,B,H)
        # TODO(synk): a batch-major in-kernel store would drop this transpose, but is
        # only a win at large T*B*H (stores become sublane-masked otherwise).
        out_bt = jnp.transpose(out, (1, 0, 2)).reshape(B * T, H)
        decoded = linear_proj(out_bt, self.linear_wT_pad, self.linear_b_pad,
                              self._tv, V)                                # (B*T, V)
        return decoded.reshape(B, T, V)

    def forward(self, whichdecoder, indices, lengths, noise=False,
                encode_only=False, noise_key=None):
        hidden = self.encode(indices, lengths, noise, noise_key)
        if encode_only:
            return hidden
        return self.decode(whichdecoder, hidden, indices, lengths)


# --------------------------------------------------------------------------- #
# Pure-JAX f32 reference (mirrors the PyTorch module) for correctness checking.
# --------------------------------------------------------------------------- #
def _ref_lstm(x_tbd, mask_tb1, w_ih, w_hh, b_ih, b_hh):
    _, B, _ = x_tbd.shape
    H = w_hh.shape[1]

    def step(carry, inp):
        h, c = carry
        x, m = inp
        gates = x @ w_ih.T + h @ w_hh.T + b_ih + b_hh
        i = jax.nn.sigmoid(gates[:, :H])
        f = jax.nn.sigmoid(gates[:, H:2 * H])
        g = jnp.tanh(gates[:, 2 * H:3 * H])
        o = jax.nn.sigmoid(gates[:, 3 * H:])
        c_new = f * c + i * g
        h_new = o * jnp.tanh(c_new)
        h2 = m * h_new + (1 - m) * h
        c2 = m * c_new + (1 - m) * c
        return (h2, c2), m * h_new

    init = (jnp.zeros((B, H), jnp.float32), jnp.zeros((B, H), jnp.float32))
    (h, _), outs = jax.lax.scan(step, init, (x_tbd, mask_tb1))
    return outs, h


def _ref_forward(model, whichdecoder, indices, lengths):
    B, T = indices.shape
    H, V = model.nhidden, model.ntokens
    mask = (jnp.arange(T)[:, None] < lengths[None, :]).astype(jnp.float32)[:, :, None]
    x = jnp.transpose(jnp.take(model.embedding, indices, axis=0), (1, 0, 2))
    h_last = None
    for layer in model.encoder_raw:
        x, h_last = _ref_lstm(x, mask, *layer)
    hidden = h_last / jnp.sqrt(jnp.sum(h_last * h_last, axis=1, keepdims=True))
    emb_w, dec = ((model.embedding_decoder1, model.decoder1_raw) if whichdecoder == 1
                  else (model.embedding_decoder2, model.decoder2_raw))
    emb = jnp.take(emb_w, indices, axis=0)
    aug = jnp.concatenate([emb, jnp.broadcast_to(hidden[:, None, :], (B, T, H))], 2)
    out, _ = _ref_lstm(jnp.transpose(aug, (1, 0, 2)), mask, *dec)
    out = jnp.transpose(out, (1, 0, 2)).reshape(B * T, H)
    return (out @ model.linear_w.T + model.linear_b).reshape(B, T, V)


# --------------------------------------------------------------------------- #
if __name__ == "__main__":
    emsize, nhidden, ntokens, nlayers = 64, 128, 256, 1
    B, maxlen = 4, 8

    key = jax.random.PRNGKey(0)
    k_model, k_idx = jax.random.split(key)

    model = Seq2Seq2DecoderPallas(emsize, nhidden, ntokens, nlayers, key=k_model)

    indices = jax.random.randint(k_idx, (B, maxlen), 0, ntokens, dtype=jnp.int32)
    # pack_padded_sequence requires sorted (descending) lengths, lengths[0] == maxlen
    lengths = jnp.array([8, 7, 5, 3], dtype=jnp.int32)

    # Tolerance is loose-ish because kernel weights/activations are bf16 on the MXU
    # (f32 accumulation); the pure-JAX reference is f32 end-to-end.
    tol = 1e-2

    decoded = jax.block_until_ready(model.forward(1, indices, lengths, noise=False))
    assert decoded.shape == (B, maxlen, ntokens)
    ref1 = jax.block_until_ready(_ref_forward(model, 1, indices, lengths))
    err1 = float(jnp.max(jnp.abs(decoded - ref1)))
    assert err1 < tol, f"decoder1 mismatch vs reference: {err1}"

    decoded2 = jax.block_until_ready(model.forward(2, indices, lengths))
    assert decoded2.shape == (B, maxlen, ntokens)
    ref2 = jax.block_until_ready(_ref_forward(model, 2, indices, lengths))
    err2 = float(jnp.max(jnp.abs(decoded2 - ref2)))
    assert err2 < tol, f"decoder2 mismatch vs reference: {err2}"

    print("KERNEL_OK")
</pallas_src>

<mosaic_0001>
module attributes {stable_mosaic.version = 11 : i64} {
  func.func @_lstm_kernel(%arg0: i32, %arg1: i32, %arg2: memref<1x64x128xbf16, #tpu.memory_space<vmem>>, %arg3: memref<8x1xi32, #tpu.memory_space<vmem>>, %arg4: memref<128x512xbf16, #tpu.memory_space<vmem>>, %arg5: memref<128x512xbf16, #tpu.memory_space<vmem>>, %arg6: memref<8x512xf32, #tpu.memory_space<vmem>>, %arg7: memref<1x64x128xf32, #tpu.memory_space<vmem>>, %arg8: memref<8x128xf32, #tpu.memory_space<vmem>>, %arg9: memref<8x128xf32, #tpu.memory_space<vmem>>, %arg10: memref<8x128xf32, #tpu.memory_space<vmem>>, %arg11: memref<64x512xf32, #tpu.memory_space<vmem>>) attributes {dimension_semantics = [#tpu.dimension_semantics<parallel>, #tpu.dimension_semantics<arbitrary>], iteration_bounds = array<i64: 1, 1>, scalar_prefetch = 0 : i64, scratch_operands = 3 : i64, tpu.core_type = #tpu.core_type<tc>, window_params = [{transform_indices = @transform_0, window_bounds = array<i64: 1, 64, 128>}, {transform_indices = @transform_1, window_bounds = array<i64: 8, 1>}, {pipeline_mode = #tpu.pipeline_mode<synchronous>, transform_indices = @transform_2, window_bounds = array<i64: 128, 512>}, {pipeline_mode = #tpu.pipeline_mode<synchronous>, transform_indices = @transform_3, window_bounds = array<i64: 128, 512>}, {transform_indices = @transform_4, window_bounds = array<i64: 8, 512>}, {transform_indices = @transform_5, window_bounds = array<i64: 1, 64, 128>}, {transform_indices = @transform_6, window_bounds = array<i64: 8, 128>}]} {
    %c0_i32 = arith.constant 0 : i32
    %0 = arith.cmpi eq, %arg1, %c0_i32 : i32
    %1 = arith.extui %0 : i1 to i32
    %c0_i32_0 = arith.constant 0 : i32
    %2 = arith.cmpi ne, %1, %c0_i32_0 : i32
    scf.if %2 {
      %cst_111 = arith.constant 0.000000e+00 : f32
      %388 = vector.broadcast %cst_111 : f32 to vector<8x128xf32>
      %c0_112 = arith.constant 0 : index
      %c0_113 = arith.constant 0 : index
      %389 = vector.load %arg9[%c0_112, %c0_113] : memref<8x128xf32, #tpu.memory_space<vmem>>, vector<8x128xf32>
      tpu.vector_store %arg9[%c0_112, %c0_113], %388 {strides = array<i32>} : memref<8x128xf32, #tpu.memory_space<vmem>>, vector<8x128xf32>,
      %cst_114 = arith.constant 0.000000e+00 : f32
      %390 = vector.broadcast %cst_114 : f32 to vector<8x128xf32>
      %c0_115 = arith.constant 0 : index
      %c0_116 = arith.constant 0 : index
      %391 = vector.load %arg10[%c0_115, %c0_116] : memref<8x128xf32, #tpu.memory_space<vmem>>, vector<8x128xf32>
      tpu.vector_store %arg10[%c0_115, %c0_116], %390 {strides = array<i32>} : memref<8x128xf32, #tpu.memory_space<vmem>>, vector<8x128xf32>,
    } else {
    }
    %c0 = arith.constant 0 : index
    %c0_1 = arith.constant 0 : index
    %c0_2 = arith.constant 0 : index
    %3 = vector.load %arg2[%c0, %c0_1, %c0_2] : memref<1x64x128xbf16, #tpu.memory_space<vmem>>, vector<1x64x128xbf16>
    %4 = vector.shape_cast %3 : vector<1x64x128xbf16> to vector<64x128xbf16>
    %c0_3 = arith.constant 0 : index
    %c0_4 = arith.constant 0 : index
    %5 = vector.load %arg4[%c0_3, %c0_4] : memref<128x512xbf16, #tpu.memory_space<vmem>>, vector<128x512xbf16>
    %cst = arith.constant dense<0.000000e+00> : vector<64x512xf32>
    %6 = tpu.matmul %4, %5, %cst {dimension_numbers = #tpu.dot_dimension_numbers<[1], [0], [0], [1], [0, 0, 1, 1], [], []>} : vector<64x128xbf16>, vector<128x512xbf16>, vector<64x512xf32> -> vector<64x512xf32>
    %c0_5 = arith.constant 0 : index
    %c0_6 = arith.constant 0 : index
    %7 = vector.load %arg6[%c0_5, %c0_6] : memref<8x512xf32, #tpu.memory_space<vmem>>, vector<8x512xf32>
    %8 = tpu.concatenate %7, %7, %7, %7, %7, %7, %7, %7 in 0 : vector<8x512xf32>, vector<8x512xf32>, vector<8x512xf32>, vector<8x512xf32>, vector<8x512xf32>, vector<8x512xf32>, vector<8x512xf32>, vector<8x512xf32> -> vector<64x512xf32>
    %9 = arith.addf %6, %8 : vector<64x512xf32>
    %c0_7 = arith.constant 0 : index
    %c0_8 = arith.constant 0 : index
    %10 = vector.load %arg11[%c0_7, %c0_8] : memref<64x512xf32, #tpu.memory_space<vmem>>, vector<64x512xf32>
    tpu.vector_store %arg11[%c0_7, %c0_8], %9 {strides = array<i32>} : memref<64x512xf32, #tpu.memory_space<vmem>>, vector<64x512xf32>,
    %c0_9 = arith.constant 0 : index
    %c0_10 = arith.constant 0 : index
    %11 = vector.load %arg3[%c0_9, %c0_10] : memref<8x1xi32, #tpu.memory_space<vmem>>, vector<8x1xi32>
    %c8_i32 = arith.constant 8 : i32
    %12 = arith.muli %arg1, %c8_i32 : i32
    %c0_11 = arith.constant 0 : index
    %c0_12 = arith.constant 0 : index
    %13 = vector.load %arg9[%c0_11, %c0_12] : memref<8x128xf32, #tpu.memory_space<vmem>>, vector<8x128xf32>
    %c0_13 = arith.constant 0 : index
    %c0_14 = arith.constant 0 : index
    %14 = vector.load %arg10[%c0_13, %c0_14] : memref<8x128xf32, #tpu.memory_space<vmem>>, vector<8x128xf32>
    %c0_15 = arith.constant 0 : index
    %c0_16 = arith.constant 0 : index
    %15 = vector.load %arg11[%c0_15, %c0_16] : memref<64x512xf32, #tpu.memory_space<vmem>>, vector<8x512xf32>
    %16 = arith.truncf %13 : vector<8x128xf32> to vector<8x128xbf16>
    %c0_17 = arith.constant 0 : index
    %c0_18 = arith.constant 0 : index
    %17 = vector.load %arg5[%c0_17, %c0_18] : memref<128x512xbf16, #tpu.memory_space<vmem>>, vector<128x512xbf16>
    %cst_19 = arith.constant dense<0.000000e+00> : vector<8x512xf32>
    %18 = tpu.matmul %16, %17, %cst_19 {dimension_numbers = #tpu.dot_dimension_numbers<[1], [0], [0], [1], [0, 0, 1, 1], [], []>} : vector<8x128xbf16>, vector<128x512xbf16>, vector<8x512xf32> -> vector<8x512xf32>
    %19 = arith.addf %15, %18 : vector<8x512xf32>
    %20 = vector.extract_strided_slice %19 {offsets = [0, 0], sizes = [8, 128], strides = [1, 1]} : vector<8x512xf32> to vector<8x128xf32>
    %21 = arith.negf %20 : vector<8x128xf32>
    %22 = math.exp %21 : vector<8x128xf32>
    %cst_20 = arith.constant 1.000000e+00 : f32
    %23 = vector.broadcast %cst_20 : f32 to vector<8x128xf32>
    %24 = arith.addf %23, %22 : vector<8x128xf32>
    %25 = arith.divf %23, %24 : vector<8x128xf32>
    %26 = vector.extract_strided_slice %19 {offsets = [0, 128], sizes = [8, 128], strides = [1, 1]} : vector<8x512xf32> to vector<8x128xf32>
    %27 = arith.negf %26 : vector<8x128xf32>
    %28 = math.exp %27 : vector<8x128xf32>
    %cst_21 = arith.constant 1.000000e+00 : f32
    %29 = vector.broadcast %cst_21 : f32 to vector<8x128xf32>
    %30 = arith.addf %29, %28 : vector<8x128xf32>
    %31 = arith.divf %29, %30 : vector<8x128xf32>
    %32 = vector.extract_strided_slice %19 {offsets = [0, 256], sizes = [8, 128], strides = [1, 1]} : vector<8x512xf32> to vector<8x128xf32>
    %33 = math.tanh %32 : vector<8x128xf32>
    %34 = vector.extract_strided_slice %19 {offsets = [0, 384], sizes = [8, 128], strides = [1, 1]} : vector<8x512xf32> to vector<8x128xf32>
    %35 = arith.negf %34 : vector<8x128xf32>
    %36 = math.exp %35 : vector<8x128xf32>
    %cst_22 = arith.constant 1.000000e+00 : f32
    %37 = vector.broadcast %cst_22 : f32 to vector<8x128xf32>
    %38 = arith.addf %37, %36 : vector<8x128xf32>
    %39 = arith.divf %37, %38 : vector<8x128xf32>
    %40 = arith.mulf %31, %14 : vector<8x128xf32>
    %41 = arith.mulf %25, %33 : vector<8x128xf32>
    %42 = arith.addf %40, %41 : vector<8x128xf32>
    %43 = math.tanh %42 : vector<8x128xf32>
    %44 = arith.mulf %39, %43 : vector<8x128xf32>
    %c0_i32_23 = arith.constant 0 : i32
    %45 = arith.addi %12, %c0_i32_23 : i32
    %46 = vector.broadcast %45 : i32 to vector<8x1xi32>
    %47 = arith.cmpi slt, %46, %11 : vector<8x1xi32>
    %48 = vector.shape_cast %47 : vector<8x1xi1> to vector<8x1xi1>
    %49 = vector.broadcast %48 : vector<8x1xi1> to vector<8x128xi1>
    %50 = arith.select %49, %44, %13 : vector<8x128xi1>, vector<8x128xf32>
    %51 = vector.shape_cast %47 : vector<8x1xi1> to vector<8x1xi1>
    %52 = vector.broadcast %51 : vector<8x1xi1> to vector<8x128xi1>
    %53 = arith.select %52, %42, %14 : vector<8x128xi1>, vector<8x128xf32>
    %cst_24 = arith.constant 0.000000e+00 : f32
    %54 = vector.shape_cast %47 : vector<8x1xi1> to vector<8x1xi1>
    %55 = vector.broadcast %54 : vector<8x1xi1> to vector<8x128xi1>
    %56 = vector.broadcast %cst_24 : f32 to vector<8x128xf32>
    %57 = arith.select %55, %44, %56 : vector<8x128xi1>, vector<8x128xf32>
    %c0_25 = arith.constant 0 : index
    %c0_26 = arith.constant 0 : index
    %c0_27 = arith.constant 0 : index
    %58 = vector.load %arg7[%c0_25, %c0_26, %c0_27] : memref<1x64x128xf32, #tpu.memory_space<vmem>>, vector<1x8x128xf32>
    %59 = vector.shape_cast %58 : vector<1x8x128xf32> to vector<8x128xf32>
    %60 = vector.shape_cast %57 : vector<8x128xf32> to vector<1x8x128xf32>
    tpu.vector_store %arg7[%c0_25, %c0_26, %c0_27], %60 {strides = array<i32>} : memref<1x64x128xf32, #tpu.memory_space<vmem>>, vector<1x8x128xf32>,
    %c8 = arith.constant 8 : index
    %c0_28 = arith.constant 0 : index
    %61 = vector.load %arg11[%c8, %c0_28] : memref<64x512xf32, #tpu.memory_space<vmem>>, vector<8x512xf32>
    %62 = arith.truncf %50 : vector<8x128xf32> to vector<8x128xbf16>
    %c0_29 = arith.constant 0 : index
    %c0_30 = arith.constant 0 : index
    %63 = vector.load %arg5[%c0_29, %c0_30] : memref<128x512xbf16, #tpu.memory_space<vmem>>, vector<128x512xbf16>
    %cst_31 = arith.constant dense<0.000000e+00> : vector<8x512xf32>
    %64 = tpu.matmul %62, %63, %cst_31 {dimension_numbers = #tpu.dot_dimension_numbers<[1], [0], [0], [1], [0, 0, 1, 1], [], []>} : vector<8x128xbf16>, vector<128x512xbf16>, vector<8x512xf32> -> vector<8x512xf32>
    %65 = arith.addf %61, %64 : vector<8x512xf32>
    %66 = vector.extract_strided_slice %65 {offsets = [0, 0], sizes = [8, 128], strides = [1, 1]} : vector<8x512xf32> to vector<8x128xf32>
    %67 = arith.negf %66 : vector<8x128xf32>
    %68 = math.exp %67 : vector<8x128xf32>
    %cst_32 = arith.constant 1.000000e+00 : f32
    %69 = vector.broadcast %cst_32 : f32 to vector<8x128xf32>
    %70 = arith.addf %69, %68 : vector<8x128xf32>
    %71 = arith.divf %69, %70 : vector<8x128xf32>
    %72 = vector.extract_strided_slice %65 {offsets = [0, 128], sizes = [8, 128], strides = [1, 1]} : vector<8x512xf32> to vector<8x128xf32>
    %73 = arith.negf %72 : vector<8x128xf32>
    %74 = math.exp %73 : vector<8x128xf32>
    %cst_33 = arith.constant 1.000000e+00 : f32
    %75 = vector.broadcast %cst_33 : f32 to vector<8x128xf32>
    %76 = arith.addf %75, %74 : vector<8x128xf32>
    %77 = arith.divf %75, %76 : vector<8x128xf32>
    %78 = vector.extract_strided_slice %65 {offsets = [0, 256], sizes = [8, 128], strides = [1, 1]} : vector<8x512xf32> to vector<8x128xf32>
    %79 = math.tanh %78 : vector<8x128xf32>
    %80 = vector.extract_strided_slice %65 {offsets = [0, 384], sizes = [8, 128], strides = [1, 1]} : vector<8x512xf32> to vector<8x128xf32>
    %81 = arith.negf %80 : vector<8x128xf32>
    %82 = math.exp %81 : vector<8x128xf32>
    %cst_34 = arith.constant 1.000000e+00 : f32
    %83 = vector.broadcast %cst_34 : f32 to vector<8x128xf32>
    %84 = arith.addf %83, %82 : vector<8x128xf32>
    %85 = arith.divf %83, %84 : vector<8x128xf32>
    %86 = arith.mulf %77, %53 : vector<8x128xf32>
    %87 = arith.mulf %71, %79 : vector<8x128xf32>
    %88 = arith.addf %86, %87 : vector<8x128xf32>
    %89 = math.tanh %88 : vector<8x128xf32>
    %90 = arith.mulf %85, %89 : vector<8x128xf32>
    %c1_i32 = arith.constant 1 : i32
    %91 = arith.addi %12, %c1_i32 : i32
    %92 = vector.broadcast %91 : i32 to vector<8x1xi32>
    %93 = arith.cmpi slt, %92, %11 : vector<8x1xi32>
    %94 = vector.shape_cast %93 : vector<8x1xi1> to vector<8x1xi1>
    %95 = vector.broadcast %94 : vector<8x1xi1> to vector<8x128xi1>
    %96 = arith.select %95, %90, %50 : vector<8x128xi1>, vector<8x128xf32>
    %97 = vector.shape_cast %93 : vector<8x1xi1> to vector<8x1xi1>
    %98 = vector.broadcast %97 : vector<8x1xi1> to vector<8x128xi1>
    %99 = arith.select %98, %88, %53 : vector<8x128xi1>, vector<8x128xf32>
    %cst_35 = arith.constant 0.000000e+00 : f32
    %100 = vector.shape_cast %93 : vector<8x1xi1> to vector<8x1xi1>
    %101 = vector.broadcast %100 : vector<8x1xi1> to vector<8x128xi1>
    %102 = vector.broadcast %cst_35 : f32 to vector<8x128xf32>
    %103 = arith.select %101, %90, %102 : vector<8x128xi1>, vector<8x128xf32>
    %c0_36 = arith.constant 0 : index
    %c8_37 = arith.constant 8 : index
    %c0_38 = arith.constant 0 : index
    %104 = vector.load %arg7[%c0_36, %c8_37, %c0_38] : memref<1x64x128xf32, #tpu.memory_space<vmem>>, vector<1x8x128xf32>
    %105 = vector.shape_cast %104 : vector<1x8x128xf32> to vector<8x128xf32>
    %106 = vector.shape_cast %103 : vector<8x128xf32> to vector<1x8x128xf32>
    tpu.vector_store %arg7[%c0_36, %c8_37, %c0_38], %106 {strides = array<i32>} : memref<1x64x128xf32, #tpu.memory_space<vmem>>, vector<1x8x128xf32>,
    %c16 = arith.constant 16 : index
    %c0_39 = arith.constant 0 : index
    %107 = vector.load %arg11[%c16, %c0_39] : memref<64x512xf32, #tpu.memory_space<vmem>>, vector<8x512xf32>
    %108 = arith.truncf %96 : vector<8x128xf32> to vector<8x128xbf16>
    %c0_40 = arith.constant 0 : index
    %c0_41 = arith.constant 0 : index
    %109 = vector.load %arg5[%c0_40, %c0_41] : memref<128x512xbf16, #tpu.memory_space<vmem>>, vector<128x512xbf16>
    %cst_42 = arith.constant dense<0.000000e+00> : vector<8x512xf32>
    %110 = tpu.matmul %108, %109, %cst_42 {dimension_numbers = #tpu.dot_dimension_numbers<[1], [0], [0], [1], [0, 0, 1, 1], [], []>} : vector<8x128xbf16>, vector<128x512xbf16>, vector<8x512xf32> -> vector<8x512xf32>
    %111 = arith.addf %107, %110 : vector<8x512xf32>
    %112 = vector.extract_strided_slice %111 {offsets = [0, 0], sizes = [8, 128], strides = [1, 1]} : vector<8x512xf32> to vector<8x128xf32>
    %113 = arith.negf %112 : vector<8x128xf32>
    %114 = math.exp %113 : vector<8x128xf32>
    %cst_43 = arith.constant 1.000000e+00 : f32
    %115 = vector.broadcast %cst_43 : f32 to vector<8x128xf32>
    %116 = arith.addf %115, %114 : vector<8x128xf32>
    %117 = arith.divf %115, %116 : vector<8x128xf32>
    %118 = vector.extract_strided_slice %111 {offsets = [0, 128], sizes = [8, 128], strides = [1, 1]} : vector<8x512xf32> to vector<8x128xf32>
    %119 = arith.negf %118 : vector<8x128xf32>
    %120 = math.exp %119 : vector<8x128xf32>
    %cst_44 = arith.constant 1.000000e+00 : f32
    %121 = vector.broadcast %cst_44 : f32 to vector<8x128xf32>
    %122 = arith.addf %121, %120 : vector<8x128xf32>
    %123 = arith.divf %121, %122 : vector<8x128xf32>
    %124 = vector.extract_strided_slice %111 {offsets = [0, 256], sizes = [8, 128], strides = [1, 1]} : vector<8x512xf32> to vector<8x128xf32>
    %125 = math.tanh %124 : vector<8x128xf32>
    %126 = vector.extract_strided_slice %111 {offsets = [0, 384], sizes = [8, 128], strides = [1, 1]} : vector<8x512xf32> to vector<8x128xf32>
    %127 = arith.negf %126 : vector<8x128xf32>
    %128 = math.exp %127 : vector<8x128xf32>
    %cst_45 = arith.constant 1.000000e+00 : f32
    %129 = vector.broadcast %cst_45 : f32 to vector<8x128xf32>
    %130 = arith.addf %129, %128 : vector<8x128xf32>
    %131 = arith.divf %129, %130 : vector<8x128xf32>
    %132 = arith.mulf %123, %99 : vector<8x128xf32>
    %133 = arith.mulf %117, %125 : vector<8x128xf32>
    %134 = arith.addf %132, %133 : vector<8x128xf32>
    %135 = math.tanh %134 : vector<8x128xf32>
    %136 = arith.mulf %131, %135 : vector<8x128xf32>
    %c2_i32 = arith.constant 2 : i32
    %137 = arith.addi %12, %c2_i32 : i32
    %138 = vector.broadcast %137 : i32 to vector<8x1xi32>
    %139 = arith.cmpi slt, %138, %11 : vector<8x1xi32>
    %140 = vector.shape_cast %139 : vector<8x1xi1> to vector<8x1xi1>
    %141 = vector.broadcast %140 : vector<8x1xi1> to vector<8x128xi1>
    %142 = arith.select %141, %136, %96 : vector<8x128xi1>, vector<8x128xf32>
    %143 = vector.shape_cast %139 : vector<8x1xi1> to vector<8x1xi1>
    %144 = vector.broadcast %143 : vector<8x1xi1> to vector<8x128xi1>
    %145 = arith.select %144, %134, %99 : vector<8x128xi1>, vector<8x128xf32>
    %cst_46 = arith.constant 0.000000e+00 : f32
    %146 = vector.shape_cast %139 : vector<8x1xi1> to vector<8x1xi1>
    %147 = vector.broadcast %146 : vector<8x1xi1> to vector<8x128xi1>
    %148 = vector.broadcast %cst_46 : f32 to vector<8x128xf32>
    %149 = arith.select %147, %136, %148 : vector<8x128xi1>, vector<8x128xf32>
    %c0_47 = arith.constant 0 : index
    %c16_48 = arith.constant 16 : index
    %c0_49 = arith.constant 0 : index
    %150 = vector.load %arg7[%c0_47, %c16_48, %c0_49] : memref<1x64x128xf32, #tpu.memory_space<vmem>>, vector<1x8x128xf32>
    %151 = vector.shape_cast %150 : vector<1x8x128xf32> to vector<8x128xf32>
    %152 = vector.shape_cast %149 : vector<8x128xf32> to vector<1x8x128xf32>
    tpu.vector_store %arg7[%c0_47, %c16_48, %c0_49], %152 {strides = array<i32>} : memref<1x64x128xf32, #tpu.memory_space<vmem>>, vector<1x8x128xf32>,
    %c24 = arith.constant 24 : index
    %c0_50 = arith.constant 0 : index
    %153 = vector.load %arg11[%c24, %c0_50] : memref<64x512xf32, #tpu.memory_space<vmem>>, vector<8x512xf32>
    %154 = arith.truncf %142 : vector<8x128xf32> to vector<8x128xbf16>
    %c0_51 = arith.constant 0 : index
    %c0_52 = arith.constant 0 : index
    %155 = vector.load %arg5[%c0_51, %c0_52] : memref<128x512xbf16, #tpu.memory_space<vmem>>, vector<128x512xbf16>
    %cst_53 = arith.constant dense<0.000000e+00> : vector<8x512xf32>
    %156 = tpu.matmul %154, %155, %cst_53 {dimension_numbers = #tpu.dot_dimension_numbers<[1], [0], [0], [1], [0, 0, 1, 1], [], []>} : vector<8x128xbf16>, vector<128x512xbf16>, vector<8x512xf32> -> vector<8x512xf32>
    %157 = arith.addf %153, %156 : vector<8x512xf32>
    %158 = vector.extract_strided_slice %157 {offsets = [0, 0], sizes = [8, 128], strides = [1, 1]} : vector<8x512xf32> to vector<8x128xf32>
    %159 = arith.negf %158 : vector<8x128xf32>
    %160 = math.exp %159 : vector<8x128xf32>
    %cst_54 = arith.constant 1.000000e+00 : f32
    %161 = vector.broadcast %cst_54 : f32 to vector<8x128xf32>
    %162 = arith.addf %161, %160 : vector<8x128xf32>
    %163 = arith.divf %161, %162 : vector<8x128xf32>
    %164 = vector.extract_strided_slice %157 {offsets = [0, 128], sizes = [8, 128], strides = [1, 1]} : vector<8x512xf32> to vector<8x128xf32>
    %165 = arith.negf %164 : vector<8x128xf32>
    %166 = math.exp %165 : vector<8x128xf32>
    %cst_55 = arith.constant 1.000000e+00 : f32
    %167 = vector.broadcast %cst_55 : f32 to vector<8x128xf32>
    %168 = arith.addf %167, %166 : vector<8x128xf32>
    %169 = arith.divf %167, %168 : vector<8x128xf32>
    %170 = vector.extract_strided_slice %157 {offsets = [0, 256], sizes = [8, 128], strides = [1, 1]} : vector<8x512xf32> to vector<8x128xf32>
    %171 = math.tanh %170 : vector<8x128xf32>
    %172 = vector.extract_strided_slice %157 {offsets = [0, 384], sizes = [8, 128], strides = [1, 1]} : vector<8x512xf32> to vector<8x128xf32>
    %173 = arith.negf %172 : vector<8x128xf32>
    %174 = math.exp %173 : vector<8x128xf32>
    %cst_56 = arith.constant 1.000000e+00 : f32
    %175 = vector.broadcast %cst_56 : f32 to vector<8x128xf32>
    %176 = arith.addf %175, %174 : vector<8x128xf32>
    %177 = arith.divf %175, %176 : vector<8x128xf32>
    %178 = arith.mulf %169, %145 : vector<8x128xf32>
    %179 = arith.mulf %163, %171 : vector<8x128xf32>
    %180 = arith.addf %178, %179 : vector<8x128xf32>
    %181 = math.tanh %180 : vector<8x128xf32>
    %182 = arith.mulf %177, %181 : vector<8x128xf32>
    %c3_i32 = arith.constant 3 : i32
    %183 = arith.addi %12, %c3_i32 : i32
    %184 = vector.broadcast %183 : i32 to vector<8x1xi32>
    %185 = arith.cmpi slt, %184, %11 : vector<8x1xi32>
    %186 = vector.shape_cast %185 : vector<8x1xi1> to vector<8x1xi1>
    %187 = vector.broadcast %186 : vector<8x1xi1> to vector<8x128xi1>
    %188 = arith.select %187, %182, %142 : vector<8x128xi1>, vector<8x128xf32>
    %189 = vector.shape_cast %185 : vector<8x1xi1> to vector<8x1xi1>
    %190 = vector.broadcast %189 : vector<8x1xi1> to vector<8x128xi1>
    %191 = arith.select %190, %180, %145 : vector<8x128xi1>, vector<8x128xf32>
    %cst_57 = arith.constant 0.000000e+00 : f32
    %192 = vector.shape_cast %185 : vector<8x1xi1> to vector<8x1xi1>
    %193 = vector.broadcast %192 : vector<8x1xi1> to vector<8x128xi1>
    %194 = vector.broadcast %cst_57 : f32 to vector<8x128xf32>
    %195 = arith.select %193, %182, %194 : vector<8x128xi1>, vector<8x128xf32>
    %c0_58 = arith.constant 0 : index
    %c24_59 = arith.constant 24 : index
    %c0_60 = arith.constant 0 : index
    %196 = vector.load %arg7[%c0_58, %c24_59, %c0_60] : memref<1x64x128xf32, #tpu.memory_space<vmem>>, vector<1x8x128xf32>
    %197 = vector.shape_cast %196 : vector<1x8x128xf32> to vector<8x128xf32>
    %198 = vector.shape_cast %195 : vector<8x128xf32> to vector<1x8x128xf32>
    tpu.vector_store %arg7[%c0_58, %c24_59, %c0_60], %198 {strides = array<i32>} : memref<1x64x128xf32, #tpu.memory_space<vmem>>, vector<1x8x128xf32>,
    %c32 = arith.constant 32 : index
    %c0_61 = arith.constant 0 : index
    %199 = vector.load %arg11[%c32, %c0_61] : memref<64x512xf32, #tpu.memory_space<vmem>>, vector<8x512xf32>
    %200 = arith.truncf %188 : vector<8x128xf32> to vector<8x128xbf16>
    %c0_62 = arith.constant 0 : index
    %c0_63 = arith.constant 0 : index
    %201 = vector.load %arg5[%c0_62, %c0_63] : memref<128x512xbf16, #tpu.memory_space<vmem>>, vector<128x512xbf16>
    %cst_64 = arith.constant dense<0.000000e+00> : vector<8x512xf32>
    %202 = tpu.matmul %200, %201, %cst_64 {dimension_numbers = #tpu.dot_dimension_numbers<[1], [0], [0], [1], [0, 0, 1, 1], [], []>} : vector<8x128xbf16>, vector<128x512xbf16>, vector<8x512xf32> -> vector<8x512xf32>
    %203 = arith.addf %199, %202 : vector<8x512xf32>
    %204 = vector.extract_strided_slice %203 {offsets = [0, 0], sizes = [8, 128], strides = [1, 1]} : vector<8x512xf32> to vector<8x128xf32>
    %205 = arith.negf %204 : vector<8x128xf32>
    %206 = math.exp %205 : vector<8x128xf32>
    %cst_65 = arith.constant 1.000000e+00 : f32
    %207 = vector.broadcast %cst_65 : f32 to vector<8x128xf32>
    %208 = arith.addf %207, %206 : vector<8x128xf32>
    %209 = arith.divf %207, %208 : vector<8x128xf32>
    %210 = vector.extract_strided_slice %203 {offsets = [0, 128], sizes = [8, 128], strides = [1, 1]} : vector<8x512xf32> to vector<8x128xf32>
    %211 = arith.negf %210 : vector<8x128xf32>
    %212 = math.exp %211 : vector<8x128xf32>
    %cst_66 = arith.constant 1.000000e+00 : f32
    %213 = vector.broadcast %cst_66 : f32 to vector<8x128xf32>
    %214 = arith.addf %213, %212 : vector<8x128xf32>
    %215 = arith.divf %213, %214 : vector<8x128xf32>
    %216 = vector.extract_strided_slice %203 {offsets = [0, 256], sizes = [8, 128], strides = [1, 1]} : vector<8x512xf32> to vector<8x128xf32>
    %217 = math.tanh %216 : vector<8x128xf32>
    %218 = vector.extract_strided_slice %203 {offsets = [0, 384], sizes = [8, 128], strides = [1, 1]} : vector<8x512xf32> to vector<8x128xf32>
    %219 = arith.negf %218 : vector<8x128xf32>
    %220 = math.exp %219 : vector<8x128xf32>
    %cst_67 = arith.constant 1.000000e+00 : f32
    %221 = vector.broadcast %cst_67 : f32 to vector<8x128xf32>
    %222 = arith.addf %221, %220 : vector<8x128xf32>
    %223 = arith.divf %221, %222 : vector<8x128xf32>
    %224 = arith.mulf %215, %191 : vector<8x128xf32>
    %225 = arith.mulf %209, %217 : vector<8x128xf32>
    %226 = arith.addf %224, %225 : vector<8x128xf32>
    %227 = math.tanh %226 : vector<8x128xf32>
    %228 = arith.mulf %223, %227 : vector<8x128xf32>
    %c4_i32 = arith.constant 4 : i32
    %229 = arith.addi %12, %c4_i32 : i32
    %230 = vector.broadcast %229 : i32 to vector<8x1xi32>
    %231 = arith.cmpi slt, %230, %11 : vector<8x1xi32>
    %232 = vector.shape_cast %231 : vector<8x1xi1> to vector<8x1xi1>
    %233 = vector.broadcast %232 : vector<8x1xi1> to vector<8x128xi1>
    %234 = arith.select %233, %228, %188 : vector<8x128xi1>, vector<8x128xf32>
    %235 = vector.shape_cast %231 : vector<8x1xi1> to vector<8x1xi1>
    %236 = vector.broadcast %235 : vector<8x1xi1> to vector<8x128xi1>
    %237 = arith.select %236, %226, %191 : vector<8x128xi1>, vector<8x128xf32>
    %cst_68 = arith.constant 0.000000e+00 : f32
    %238 = vector.shape_cast %231 : vector<8x1xi1> to vector<8x1xi1>
    %239 = vector.broadcast %238 : vector<8x1xi1> to vector<8x128xi1>
    %240 = vector.broadcast %cst_68 : f32 to vector<8x128xf32>
    %241 = arith.select %239, %228, %240 : vector<8x128xi1>, vector<8x128xf32>
    %c0_69 = arith.constant 0 : index
    %c32_70 = arith.constant 32 : index
    %c0_71 = arith.constant 0 : index
    %242 = vector.load %arg7[%c0_69, %c32_70, %c0_71] : memref<1x64x128xf32, #tpu.memory_space<vmem>>, vector<1x8x128xf32>
    %243 = vector.shape_cast %242 : vector<1x8x128xf32> to vector<8x128xf32>
    %244 = vector.shape_cast %241 : vector<8x128xf32> to vector<1x8x128xf32>
    tpu.vector_store %arg7[%c0_69, %c32_70, %c0_71], %244 {strides = array<i32>} : memref<1x64x128xf32, #tpu.memory_space<vmem>>, vector<1x8x128xf32>,
    %c40 = arith.constant 40 : index
    %c0_72 = arith.constant 0 : index
    %245 = vector.load %arg11[%c40, %c0_72] : memref<64x512xf32, #tpu.memory_space<vmem>>, vector<8x512xf32>
    %246 = arith.truncf %234 : vector<8x128xf32> to vector<8x128xbf16>
    %c0_73 = arith.constant 0 : index
    %c0_74 = arith.constant 0 : index
    %247 = vector.load %arg5[%c0_73, %c0_74] : memref<128x512xbf16, #tpu.memory_space<vmem>>, vector<128x512xbf16>
    %cst_75 = arith.constant dense<0.000000e+00> : vector<8x512xf32>
    %248 = tpu.matmul %246, %247, %cst_75 {dimension_numbers = #tpu.dot_dimension_numbers<[1], [0], [0], [1], [0, 0, 1, 1], [], []>} : vector<8x128xbf16>, vector<128x512xbf16>, vector<8x512xf32> -> vector<8x512xf32>
    %249 = arith.addf %245, %248 : vector<8x512xf32>
    %250 = vector.extract_strided_slice %249 {offsets = [0, 0], sizes = [8, 128], strides = [1, 1]} : vector<8x512xf32> to vector<8x128xf32>
    %251 = arith.negf %250 : vector<8x128xf32>
    %252 = math.exp %251 : vector<8x128xf32>
    %cst_76 = arith.constant 1.000000e+00 : f32
    %253 = vector.broadcast %cst_76 : f32 to vector<8x128xf32>
    %254 = arith.addf %253, %252 : vector<8x128xf32>
    %255 = arith.divf %253, %254 : vector<8x128xf32>
    %256 = vector.extract_strided_slice %249 {offsets = [0, 128], sizes = [8, 128], strides = [1, 1]} : vector<8x512xf32> to vector<8x128xf32>
    %257 = arith.negf %256 : vector<8x128xf32>
    %258 = math.exp %257 : vector<8x128xf32>
    %cst_77 = arith.constant 1.000000e+00 : f32
    %259 = vector.broadcast %cst_77 : f32 to vector<8x128xf32>
    %260 = arith.addf %259, %258 : vector<8x128xf32>
    %261 = arith.divf %259, %260 : vector<8x128xf32>
    %262 = vector.extract_strided_slice %249 {offsets = [0, 256], sizes = [8, 128], strides = [1, 1]} : vector<8x512xf32> to vector<8x128xf32>
    %263 = math.tanh %262 : vector<8x128xf32>
    %264 = vector.extract_strided_slice %249 {offsets = [0, 384], sizes = [8, 128], strides = [1, 1]} : vector<8x512xf32> to vector<8x128xf32>
    %265 = arith.negf %264 : vector<8x128xf32>
    %266 = math.exp %265 : vector<8x128xf32>
    %cst_78 = arith.constant 1.000000e+00 : f32
    %267 = vector.broadcast %cst_78 : f32 to vector<8x128xf32>
    %268 = arith.addf %267, %266 : vector<8x128xf32>
    %269 = arith.divf %267, %268 : vector<8x128xf32>
    %270 = arith.mulf %261, %237 : vector<8x128xf32>
    %271 = arith.mulf %255, %263 : vector<8x128xf32>
    %272 = arith.addf %270, %271 : vector<8x128xf32>
    %273 = math.tanh %272 : vector<8x128xf32>
    %274 = arith.mulf %269, %273 : vector<8x128xf32>
    %c5_i32 = arith.constant 5 : i32
    %275 = arith.addi %12, %c5_i32 : i32
    %276 = vector.broadcast %275 : i32 to vector<8x1xi32>
    %277 = arith.cmpi slt, %276, %11 : vector<8x1xi32>
    %278 = vector.shape_cast %277 : vector<8x1xi1> to vector<8x1xi1>
    %279 = vector.broadcast %278 : vector<8x1xi1> to vector<8x128xi1>
    %280 = arith.select %279, %274, %234 : vector<8x128xi1>, vector<8x128xf32>
    %281 = vector.shape_cast %277 : vector<8x1xi1> to vector<8x1xi1>
    %282 = vector.broadcast %281 : vector<8x1xi1> to vector<8x128xi1>
    %283 = arith.select %282, %272, %237 : vector<8x128xi1>, vector<8x128xf32>
    %cst_79 = arith.constant 0.000000e+00 : f32
    %284 = vector.shape_cast %277 : vector<8x1xi1> to vector<8x1xi1>
    %285 = vector.broadcast %284 : vector<8x1xi1> to vector<8x128xi1>
    %286 = vector.broadcast %cst_79 : f32 to vector<8x128xf32>
    %287 = arith.select %285, %274, %286 : vector<8x128xi1>, vector<8x128xf32>
    %c0_80 = arith.constant 0 : index
    %c40_81 = arith.constant 40 : index
    %c0_82 = arith.constant 0 : index
    %288 = vector.load %arg7[%c0_80, %c40_81, %c0_82] : memref<1x64x128xf32, #tpu.memory_space<vmem>>, vector<1x8x128xf32>
    %289 = vector.shape_cast %288 : vector<1x8x128xf32> to vector<8x128xf32>
    %290 = vector.shape_cast %287 : vector<8x128xf32> to vector<1x8x128xf32>
    tpu.vector_store %arg7[%c0_80, %c40_81, %c0_82], %290 {strides = array<i32>} : memref<1x64x128xf32, #tpu.memory_space<vmem>>, vector<1x8x128xf32>,
    %c48 = arith.constant 48 : index
    %c0_83 = arith.constant 0 : index
    %291 = vector.load %arg11[%c48, %c0_83] : memref<64x512xf32, #tpu.memory_space<vmem>>, vector<8x512xf32>
    %292 = arith.truncf %280 : vector<8x128xf32> to vector<8x128xbf16>
    %c0_84 = arith.constant 0 : index
    %c0_85 = arith.constant 0 : index
    %293 = vector.load %arg5[%c0_84, %c0_85] : memref<128x512xbf16, #tpu.memory_space<vmem>>, vector<128x512xbf16>
    %cst_86 = arith.constant dense<0.000000e+00> : vector<8x512xf32>
    %294 = tpu.matmul %292, %293, %cst_86 {dimension_numbers = #tpu.dot_dimension_numbers<[1], [0], [0], [1], [0, 0, 1, 1], [], []>} : vector<8x128xbf16>, vector<128x512xbf16>, vector<8x512xf32> -> vector<8x512xf32>
    %295 = arith.addf %291, %294 : vector<8x512xf32>
    %296 = vector.extract_strided_slice %295 {offsets = [0, 0], sizes = [8, 128], strides = [1, 1]} : vector<8x512xf32> to vector<8x128xf32>
    %297 = arith.negf %296 : vector<8x128xf32>
    %298 = math.exp %297 : vector<8x128xf32>
    %cst_87 = arith.constant 1.000000e+00 : f32
    %299 = vector.broadcast %cst_87 : f32 to vector<8x128xf32>
    %300 = arith.addf %299, %298 : vector<8x128xf32>
    %301 = arith.divf %299, %300 : vector<8x128xf32>
    %302 = vector.extract_strided_slice %295 {offsets = [0, 128], sizes = [8, 128], strides = [1, 1]} : vector<8x512xf32> to vector<8x128xf32>
    %303 = arith.negf %302 : vector<8x128xf32>
    %304 = math.exp %303 : vector<8x128xf32>
    %cst_88 = arith.constant 1.000000e+00 : f32
    %305 = vector.broadcast %cst_88 : f32 to vector<8x128xf32>
    %306 = arith.addf %305, %304 : vector<8x128xf32>
    %307 = arith.divf %305, %306 : vector<8x128xf32>
    %308 = vector.extract_strided_slice %295 {offsets = [0, 256], sizes = [8, 128], strides = [1, 1]} : vector<8x512xf32> to vector<8x128xf32>
    %309 = math.tanh %308 : vector<8x128xf32>
    %310 = vector.extract_strided_slice %295 {offsets = [0, 384], sizes = [8, 128], strides = [1, 1]} : vector<8x512xf32> to vector<8x128xf32>
    %311 = arith.negf %310 : vector<8x128xf32>
    %312 = math.exp %311 : vector<8x128xf32>
    %cst_89 = arith.constant 1.000000e+00 : f32
    %313 = vector.broadcast %cst_89 : f32 to vector<8x128xf32>
    %314 = arith.addf %313, %312 : vector<8x128xf32>
    %315 = arith.divf %313, %314 : vector<8x128xf32>
    %316 = arith.mulf %307, %283 : vector<8x128xf32>
    %317 = arith.mulf %301, %309 : vector<8x128xf32>
    %318 = arith.addf %316, %317 : vector<8x128xf32>
    %319 = math.tanh %318 : vector<8x128xf32>
    %320 = arith.mulf %315, %319 : vector<8x128xf32>
    %c6_i32 = arith.constant 6 : i32
    %321 = arith.addi %12, %c6_i32 : i32
    %322 = vector.broadcast %321 : i32 to vector<8x1xi32>
    %323 = arith.cmpi slt, %322, %11 : vector<8x1xi32>
    %324 = vector.shape_cast %323 : vector<8x1xi1> to vector<8x1xi1>
    %325 = vector.broadcast %324 : vector<8x1xi1> to vector<8x128xi1>
    %326 = arith.select %325, %320, %280 : vector<8x128xi1>, vector<8x128xf32>
    %327 = vector.shape_cast %323 : vector<8x1xi1> to vector<8x1xi1>
    %328 = vector.broadcast %327 : vector<8x1xi1> to vector<8x128xi1>
    %329 = arith.select %328, %318, %283 : vector<8x128xi1>, vector<8x128xf32>
    %cst_90 = arith.constant 0.000000e+00 : f32
    %330 = vector.shape_cast %323 : vector<8x1xi1> to vector<8x1xi1>
    %331 = vector.broadcast %330 : vector<8x1xi1> to vector<8x128xi1>
    %332 = vector.broadcast %cst_90 : f32 to vector<8x128xf32>
    %333 = arith.select %331, %320, %332 : vector<8x128xi1>, vector<8x128xf32>
    %c0_91 = arith.constant 0 : index
    %c48_92 = arith.constant 48 : index
    %c0_93 = arith.constant 0 : index
    %334 = vector.load %arg7[%c0_91, %c48_92, %c0_93] : memref<1x64x128xf32, #tpu.memory_space<vmem>>, vector<1x8x128xf32>
    %335 = vector.shape_cast %334 : vector<1x8x128xf32> to vector<8x128xf32>
    %336 = vector.shape_cast %333 : vector<8x128xf32> to vector<1x8x128xf32>
    tpu.vector_store %arg7[%c0_91, %c48_92, %c0_93], %336 {strides = array<i32>} : memref<1x64x128xf32, #tpu.memory_space<vmem>>, vector<1x8x128xf32>,
    %c56 = arith.constant 56 : index
    %c0_94 = arith.constant 0 : index
    %337 = vector.load %arg11[%c56, %c0_94] : memref<64x512xf32, #tpu.memory_space<vmem>>, vector<8x512xf32>
    %338 = arith.truncf %326 : vector<8x128xf32> to vector<8x128xbf16>
    %c0_95 = arith.constant 0 : index
    %c0_96 = arith.constant 0 : index
    %339 = vector.load %arg5[%c0_95, %c0_96] : memref<128x512xbf16, #tpu.memory_space<vmem>>, vector<128x512xbf16>
    %cst_97 = arith.constant dense<0.000000e+00> : vector<8x512xf32>
    %340 = tpu.matmul %338, %339, %cst_97 {dimension_numbers = #tpu.dot_dimension_numbers<[1], [0], [0], [1], [0, 0, 1, 1], [], []>} : vector<8x128xbf16>, vector<128x512xbf16>, vector<8x512xf32> -> vector<8x512xf32>
    %341 = arith.addf %337, %340 : vector<8x512xf32>
    %342 = vector.extract_strided_slice %341 {offsets = [0, 0], sizes = [8, 128], strides = [1, 1]} : vector<8x512xf32> to vector<8x128xf32>
    %343 = arith.negf %342 : vector<8x128xf32>
    %344 = math.exp %343 : vector<8x128xf32>
    %cst_98 = arith.constant 1.000000e+00 : f32
    %345 = vector.broadcast %cst_98 : f32 to vector<8x128xf32>
    %346 = arith.addf %345, %344 : vector<8x128xf32>
    %347 = arith.divf %345, %346 : vector<8x128xf32>
    %348 = vector.extract_strided_slice %341 {offsets = [0, 128], sizes = [8, 128], strides = [1, 1]} : vector<8x512xf32> to vector<8x128xf32>
    %349 = arith.negf %348 : vector<8x128xf32>
    %350 = math.exp %349 : vector<8x128xf32>
    %cst_99 = arith.constant 1.000000e+00 : f32
    %351 = vector.broadcast %cst_99 : f32 to vector<8x128xf32>
    %352 = arith.addf %351, %350 : vector<8x128xf32>
    %353 = arith.divf %351, %352 : vector<8x128xf32>
    %354 = vector.extract_strided_slice %341 {offsets = [0, 256], sizes = [8, 128], strides = [1, 1]} : vector<8x512xf32> to vector<8x128xf32>
    %355 = math.tanh %354 : vector<8x128xf32>
    %356 = vector.extract_strided_slice %341 {offsets = [0, 384], sizes = [8, 128], strides = [1, 1]} : vector<8x512xf32> to vector<8x128xf32>
    %357 = arith.negf %356 : vector<8x128xf32>
    %358 = math.exp %357 : vector<8x128xf32>
    %cst_100 = arith.constant 1.000000e+00 : f32
    %359 = vector.broadcast %cst_100 : f32 to vector<8x128xf32>
    %360 = arith.addf %359, %358 : vector<8x128xf32>
    %361 = arith.divf %359, %360 : vector<8x128xf32>
    %362 = arith.mulf %353, %329 : vector<8x128xf32>
    %363 = arith.mulf %347, %355 : vector<8x128xf32>
    %364 = arith.addf %362, %363 : vector<8x128xf32>
    %365 = math.tanh %364 : vector<8x128xf32>
    %366 = arith.mulf %361, %365 : vector<8x128xf32>
    %c7_i32 = arith.constant 7 : i32
    %367 = arith.addi %12, %c7_i32 : i32
    %368 = vector.broadcast %367 : i32 to vector<8x1xi32>
    %369 = arith.cmpi slt, %368, %11 : vector<8x1xi32>
    %370 = vector.shape_cast %369 : vector<8x1xi1> to vector<8x1xi1>
    %371 = vector.broadcast %370 : vector<8x1xi1> to vector<8x128xi1>
    %372 = arith.select %371, %366, %326 : vector<8x128xi1>, vector<8x128xf32>
    %373 = vector.shape_cast %369 : vector<8x1xi1> to vector<8x1xi1>
    %374 = vector.broadcast %373 : vector<8x1xi1> to vector<8x128xi1>
    %375 = arith.select %374, %364, %329 : vector<8x128xi1>, vector<8x128xf32>
    %cst_101 = arith.constant 0.000000e+00 : f32
    %376 = vector.shape_cast %369 : vector<8x1xi1> to vector<8x1xi1>
    %377 = vector.broadcast %376 : vector<8x1xi1> to vector<8x128xi1>
    %378 = vector.broadcast %cst_101 : f32 to vector<8x128xf32>
    %379 = arith.select %377, %366, %378 : vector<8x128xi1>, vector<8x128xf32>
    %c0_102 = arith.constant 0 : index
    %c56_103 = arith.constant 56 : index
    %c0_104 = arith.constant 0 : index
    %380 = vector.load %arg7[%c0_102, %c56_103, %c0_104] : memref<1x64x128xf32, #tpu.memory_space<vmem>>, vector<1x8x128xf32>
    %381 = vector.shape_cast %380 : vector<1x8x128xf32> to vector<8x128xf32>
    %382 = vector.shape_cast %379 : vector<8x128xf32> to vector<1x8x128xf32>
    tpu.vector_store %arg7[%c0_102, %c56_103, %c0_104], %382 {strides = array<i32>} : memref<1x64x128xf32, #tpu.memory_space<vmem>>, vector<1x8x128xf32>,
    %c0_105 = arith.constant 0 : index
    %c0_106 = arith.constant 0 : index
    %383 = vector.load %arg9[%c0_105, %c0_106] : memref<8x128xf32, #tpu.memory_space<vmem>>, vector<8x128xf32>
    tpu.vector_store %arg9[%c0_105, %c0_106], %372 {strides = array<i32>} : memref<8x128xf32, #tpu.memory_space<vmem>>, vector<8x128xf32>,
    %c0_107 = arith.constant 0 : index
    %c0_108 = arith.constant 0 : index
    %384 = vector.load %arg10[%c0_107, %c0_108] : memref<8x128xf32, #tpu.memory_space<vmem>>, vector<8x128xf32>
    tpu.vector_store %arg10[%c0_107, %c0_108], %375 {strides = array<i32>} : memref<8x128xf32, #tpu.memory_space<vmem>>, vector<8x128xf32>,
    %c0_i32_109 = arith.constant 0 : i32
    %385 = arith.cmpi eq, %arg1, %c0_i32_109 : i32
    %386 = arith.extui %385 : i1 to i32
    %c0_i32_110 = arith.constant 0 : i32
    %387 = arith.cmpi ne, %386, %c0_i32_110 : i32
    scf.if %387 {
      %388 = arith.mulf %372, %372 : vector<8x128xf32>
      %cst_111 = arith.constant dense<0.000000e+00> : vector<8xf32>
      %389 = vector.multi_reduction <add>, %388, %cst_111 [1] : vector<8x128xf32> to vector<8xf32>
      %390 = vector.shape_cast %389 : vector<8xf32> to vector<8x1xf32>
      %391 = math.sqrt %390 : vector<8x1xf32>
      %392 = vector.broadcast %391 : vector<8x1xf32> to vector<8x128xf32>
      %393 = arith.divf %372, %392 : vector<8x128xf32>
      %c0_112 = arith.constant 0 : index
      %c0_113 = arith.constant 0 : index
      %394 = vector.load %arg8[%c0_112, %c0_113] : memref<8x128xf32, #tpu.memory_space<vmem>>, vector<8x128xf32>
      tpu.vector_store %arg8[%c0_112, %c0_113], %393 {strides = array<i32>} : memref<8x128xf32, #tpu.memory_space<vmem>>, vector<8x128xf32>,
    } else {
    }
    return
  }
  func.func @transform_0(%arg0: i32, %arg1: i32) -> (i32, i32, i32) {
    %c0_i32 = arith.constant 0 : i32
    %c0_i32_0 = arith.constant 0 : i32
    return %arg0, %arg1, %c0_i32 : i32, i32, i32
  }
  func.func @transform_1(%arg0: i32, %arg1: i32) -> (i32, i32) {
    %c0_i32 = arith.constant 0 : i32
    %c0_i32_0 = arith.constant 0 : i32
    return %arg0, %c0_i32 : i32, i32
  }
  func.func @transform_2(%arg0: i32, %arg1: i32) -> (i32, i32) {
    %c0_i32 = arith.constant 0 : i32
    %c0_i32_0 = arith.constant 0 : i32
    %c0_i32_1 = arith.constant 0 : i32
    return %c0_i32, %c0_i32_0 : i32, i32
  }
  func.func @transform_3(%arg0: i32, %arg1: i32) -> (i32, i32) {
    %c0_i32 = arith.constant 0 : i32
    %c0_i32_0 = arith.constant 0 : i32
    %c0_i32_1 = arith.constant 0 : i32
    return %c0_i32, %c0_i32_0 : i32, i32
  }
  func.func @transform_4(%arg0: i32, %arg1: i32) -> (i32, i32) {
    %c0_i32 = arith.constant 0 : i32
    %c0_i32_0 = arith.constant 0 : i32
    return %arg0, %c0_i32 : i32, i32
  }
  func.func @transform_5(%arg0: i32, %arg1: i32) -> (i32, i32, i32) {
    %c0_i32 = arith.constant 0 : i32
    %c0_i32_0 = arith.constant 0 : i32
    return %arg0, %arg1, %c0_i32 : i32, i32, i32
  }
  func.func @transform_6(%arg0: i32, %arg1: i32) -> (i32, i32) {
    %c0_i32 = arith.constant 0 : i32
    %c0_i32_0 = arith.constant 0 : i32
    return %arg0, %c0_i32 : i32, i32
  }
}

</mosaic_0001>

<bundles_post_ra>
// kernel: tpu_custom_call.1
= control target key start
LH: loop header
LB: loop body
LE: loop exit
PB: predicated region body
PF: predicated region fallthrough
CT: control target
= control target key end

     0   :  { %12 = vsyncpa [#allocation6], 0  ;;  %s4546_s0 = inlined_call_operand.hbm [shape: bf16[1,64,128], index: 0, kind: input, shape index: {}]   ;;  %s4547_s1 = inlined_call_operand.vmem [shape: s32[8,1], index: 1, kind: input, shape index: {}]   ;;  %s4548_s2 = inlined_call_operand.hbm [shape: bf16[128,512], index: 2, kind: input, shape index: {}]   ;;  %s4549_s3 = inlined_call_operand.hbm [shape: bf16[128,512], index: 3, kind: input, shape index: {}]   ;;  %s4550_s4 = inlined_call_operand.hbm [shape: f32[8,512], index: 4, kind: input, shape index: {}]   ;;  %s4551_s5 = inlined_call_operand.hbm [shape: f32[1,64,128], index: 5, kind: output, shape index: {0}]   ;;  %s4552_s6 = inlined_call_operand.hbm [shape: f32[8,128], index: 6, kind: output, shape index: {1}]  }
   0x1   :  { %13 = vsyncpa [#allocation9], 0 }
   0x2   :  { %14 = vsyncpa [#allocation12], 0 }
   0x3   :  { %15 = vsyncpa [#allocation7], 0 }
   0x4   :  { %16 = vsyncpa [#allocation15], 0  ;;  %s3894_s21 = smov [#allocation8]  }
   0x5   :  { %s36_s22 = sshll.u32 %s3894_s21, 4  ;;  %s37_s22 = int_to_ptr.vmem [resolvable:$true] %s36_s22 }
   0x6   :  { %s3772_s23 = scalar_lea.vmem %s37_s22, 4096  ;;  %p3777_p1 = scmp.lt.s32.totalorder %s37_s22, %s37_s22 }
   0x7   :  { %p3773_p0 = scmp.ne.s32.totalorder %s37_s22, %s3772_s23  ;;  %p3778_p2 = scmp.lt.s32.totalorder %s3772_s23, %s3772_s23 }
   0x9   :  { %p3779_p3 = por %p3778_p2, %p3777_p1 }
   0xb   :  { %p3780_p4 = pnand %p3779_p3, %p3773_p0 }
   0xd   :  { %3783 = shalt.err (!%p3780_p4)
}
   0xe   :  { %s3895_s24 = smov 256   ;;  %s3896_s25 = smov 16  }
   0xf   :  { %42 = dma.hbm_to_vmem [thread:$0]  %s4548_s2, 4096, %s37_s22, [#allocation9], %s3895_s24, %s3895_s24, %s3896_s25  }
  0x10   :  { %s3897_s28 = smov [#allocation5]  }
  0x11   :  { %s22_s29 = sshll.u32 %s3897_s28, 4  ;;  %s23_s29 = int_to_ptr.vmem [resolvable:$true] %s22_s29 }
  0x12   :  { %s3792_s30 = scalar_lea.vmem %s23_s29, 512  ;;  %p3797_p6 = scmp.lt.s32.totalorder %s23_s29, %s23_s29 }
  0x13   :  { %p3793_p5 = scmp.ne.s32.totalorder %s23_s29, %s3792_s30  ;;  %p3798_p7 = scmp.lt.s32.totalorder %s3792_s30, %s3792_s30 }
  0x15   :  { %p3799_p8 = por %p3798_p7, %p3797_p6 }
  0x17   :  { %p3800_p9 = pnand %p3799_p8, %p3793_p5 }
  0x19   :  { %3803 = shalt.err (!%p3800_p9)
}
  0x1a   :  { %s3898_s7 = smov 64   ;;  %s3899_s8 = smov 4  }
  0x1b   :  { %28 = dma.hbm_to_vmem [thread:$0]  %s4546_s0, 512, %s23_s29, [#allocation6], %s3898_s7, %s3898_s7, %s3899_s8  }
  0x1c   :  { %s3900_s11 = smov [#allocation10]   ;;  %s3901_s13 = smov [#allocation11]  }
  0x1d   :  { %s48_s12 = sshll.u32 %s3900_s11, 4  ;;  %s61_s2 = sshll.u32 %s3901_s13, 4  ;;  %s49_s12 = int_to_ptr.vmem [resolvable:$true] %s48_s12  ;;  %s62_s2 = int_to_ptr.vmem [resolvable:$true] %s61_s2 }
  0x1e   :  { %s3812_s14 = scalar_lea.vmem %s49_s12, 4096  ;;  %p3817_p11 = scmp.lt.s32.totalorder %s49_s12, %s49_s12 }
  0x1f   :  { %p3813_p10 = scmp.ne.s32.totalorder %s49_s12, %s3812_s14  ;;  %p3818_p12 = scmp.lt.s32.totalorder %s3812_s14, %s3812_s14 }
  0x21   :  { %p3819_p13 = por %p3818_p12, %p3817_p11 }
  0x23   :  { %p3820_p0 = pnand %p3819_p13, %p3813_p10 }
  0x25   :  { %3823 = shalt.err (!%p3820_p0)
}
  0x26   :  { %54 = dma.hbm_to_vmem [thread:$0]  %s4549_s3, 4096, %s49_s12, [#allocation9], %s3895_s24, %s3895_s24, %s3896_s25  }
  0x27   :  { %s3832_s0 = scalar_lea.vmem %s62_s2, 512  ;;  %p3837_p2 = scmp.lt.s32.totalorder %s62_s2, %s62_s2 }
  0x28   :  { %p3833_p1 = scmp.ne.s32.totalorder %s62_s2, %s3832_s0  ;;  %p3838_p3 = scmp.lt.s32.totalorder %s3832_s0, %s3832_s0 }
  0x2a   :  { %p3839_p4 = por %p3838_p3, %p3837_p2 }
  0x2c   :  { %p3840_p5 = pnand %p3839_p4, %p3833_p1 }
  0x2e   :  { %3843 = shalt.err (!%p3840_p5)
}
  0x2f   :  { %64 = dma.hbm_to_vmem [thread:$0]  %s4550_s4, 512, %s62_s2, [#allocation12]  }
  0x30   :  { %3884 = dma.done.wait [#allocation6], 512  }
  0x31   :  { %3885 = vsyncadd [#allocation6], 4294966784 }
  0x32   :  { %3886 = dma.done.wait [#allocation9], 8192  }
  0x33   :  { %3887 = vsyncadd [#allocation9], 4294959104 }
  0x34   :  { %3888 = dma.done.wait [#allocation12], 512  }
  0x35   :  { %3889 = vsyncadd [#allocation12], 4294966784  ;;  %v4553_v0 = vmov 0   ;;  %v3442_v1 = vld [vmem:[#allocation8 + $0xe4] ss:$16 sps:$4 sm:$0xff]   ;;  %v3503_v44 = vld [vmem:[#allocation5 + $0x8] sm:$0xff]  }
  0x36   :  { %344 = vmatprep.mubr.bf16.mxu0 %v4553_v0  ;;  %417 = vmatprep.mubr.bf16.mxu1 %v4553_v0  ;;  %v3444_v2 = vld [vmem:[#allocation8 + $0xec] ss:$16 sps:$4 sm:$0xff]   ;;  %v3446_v3 = vld [vmem:[#allocation8 + $0xe0] ss:$16 sps:$4 sm:$0xff]   ;;  %v3447_v4 = vld [vmem:[#allocation8 + $0xe8] ss:$16 sps:$4 sm:$0xff]  }
  0x37   :  { %3440 = vset.pattern.permute.xlu0 %v4553_v0  ;;  %3441 = vset.pattern.permute.xlu1 %v4553_v0  ;;  %v3448_v5 = vld [vmem:[#allocation8 + $0xc4] ss:$16 sps:$4 sm:$0xff]   ;;  %v3450_v6 = vld [vmem:[#allocation8 + $0xcc] ss:$16 sps:$4 sm:$0xff]   ;;  %v3452_v7 = vld [vmem:[#allocation8 + $0xc0] ss:$16 sps:$4 sm:$0xff]  }
  0x38   :  { %312 = vmatprep.subr.bf16.mxu0 %v3442_v1  ;;  %385 = vmatprep.subr.bf16.mxu1 %v3444_v2  ;;  %v3453_v8 = vld [vmem:[#allocation8 + $0xc8] ss:$16 sps:$4 sm:$0xff]   ;;  %v3454_v9 = vld [vmem:[#allocation8 + $0xa4] ss:$16 sps:$4 sm:$0xff]   ;;  %v3456_v10 = vld [vmem:[#allocation8 + $0xac] ss:$16 sps:$4 sm:$0xff]  }
  0x39   :  { %313 = vmatpush1.bf16.msra.mxu0 %v3446_v3  ;;  %386 = vmatpush1.bf16.msra.mxu1 %v3447_v4  ;;  %v3458_v11 = vld [vmem:[#allocation8 + $0xa0] ss:$16 sps:$4 sm:$0xff]   ;;  %v3459_v12 = vld [vmem:[#allocation8 + $0xa8] ss:$16 sps:$4 sm:$0xff]   ;;  %v3460_v13 = vld [vmem:[#allocation8 + $0x84] ss:$16 sps:$4 sm:$0xff]  }
  0x3a   :  { %314 = vmatprep.subr.bf16.mxu0 %v3448_v5  ;;  %387 = vmatprep.subr.bf16.mxu1 %v3450_v6  ;;  %v3462_v14 = vld [vmem:[#allocation8 + $0x8c] ss:$16 sps:$4 sm:$0xff]   ;;  %v3464_v15 = vld [vmem:[#allocation8 + $0x80] ss:$16 sps:$4 sm:$0xff]   ;;  %v3465_v16 = vld [vmem:[#allocation8 + $0x88] ss:$16 sps:$4 sm:$0xff]  }
  0x3b   :  { %v3466_v17 = vld [vmem:[#allocation8 + $0x64] ss:$16 sps:$4 sm:$0xff]   ;;  %v3468_v18 = vld [vmem:[#allocation8 + $0x6c] ss:$16 sps:$4 sm:$0xff]   ;;  %v3470_v19 = vld [vmem:[#allocation8 + $0x60] ss:$16 sps:$4 sm:$0xff]  }
  0x3c   :  { %v3471_v20 = vld [vmem:[#allocation8 + $0x68] ss:$16 sps:$4 sm:$0xff]   ;;  %v3472_v21 = vld [vmem:[#allocation8 + $0x44] ss:$16 sps:$4 sm:$0xff]   ;;  %v3474_v22 = vld [vmem:[#allocation8 + $0x4c] ss:$16 sps:$4 sm:$0xff]  }
  0x3d   :  { %315 = vmatpush1.bf16.msra.mxu0 %v3452_v7  ;;  %388 = vmatpush1.bf16.msra.mxu1 %v3453_v8  ;;  %v3476_v23 = vld [vmem:[#allocation8 + $0x40] ss:$16 sps:$4 sm:$0xff]   ;;  %v3477_v24 = vld [vmem:[#allocation8 + $0x48] ss:$16 sps:$4 sm:$0xff]   ;;  %v3478_v25 = vld [vmem:[#allocation8 + $0x24] ss:$16 sps:$4 sm:$0xff]  }
  0x3e   :  { %316 = vmatprep.subr.bf16.mxu0 %v3454_v9  ;;  %389 = vmatprep.subr.bf16.mxu1 %v3456_v10  ;;  %v3480_v26 = vld [vmem:[#allocation8 + $0x2c] ss:$16 sps:$4 sm:$0xff]   ;;  %v3482_v27 = vld [vmem:[#allocation8 + $0x20] ss:$16 sps:$4 sm:$0xff]   ;;  %v3483_v28 = vld [vmem:[#allocation8 + $0x28] ss:$16 sps:$4 sm:$0xff]  }
  0x3f   :  { %v3484_v29 = vld [vmem:[#allocation8 + $0x4] ss:$16 sps:$4 sm:$0xff]   ;;  %v3486_v30 = vld [vmem:[#allocation8 + $0xc] ss:$16 sps:$4 sm:$0xff]   ;;  %v3488_v31 = vld [vmem:[#allocation8] ss:$16 sps:$4 sm:$0xff]  }
  0x40   :  { %v3489_v32 = vld [vmem:[#allocation8 + $0x8] ss:$16 sps:$4 sm:$0xff]   ;;  %v3965_v33 = vld [vmem:[#allocation10 + $0xe4] ss:$16 sps:$4 sm:$0xff]   ;;  %v3967_v34 = vld [vmem:[#allocation10 + $0xec] ss:$16 sps:$4 sm:$0xff]  }
  0x41   :  { %317 = vmatpush1.bf16.msra.mxu0 %v3458_v11  ;;  %390 = vmatpush1.bf16.msra.mxu1 %v3459_v12  ;;  %v3490_v35 = vld [vmem:[#allocation5] sm:$0xff]   ;;  %v3971_v37 = vld [vmem:[#allocation10 + $0xe8] ss:$16 sps:$4 sm:$0xff]   ;;  %v3977_v39 = vld [vmem:[#allocation10 + $0xcc] ss:$16 sps:$4 sm:$0xff]   ;;  %v3903_v11 = vmov 0.0|0.0  }
  0x42   :  { %318 = vmatprep.subr.bf16.mxu0 %v3460_v13  ;;  %391 = vmatprep.subr.bf16.mxu1 %v3462_v14  ;;  %v3969_v36 = vld [vmem:[#allocation10 + $0xe0] ss:$16 sps:$4 sm:$0xff]   ;;  %v3975_v38 = vld [vmem:[#allocation10 + $0xc4] ss:$16 sps:$4 sm:$0xff]   ;;  %v3983_v41 = vld [vmem:[#allocation10 + $0xc8] ss:$16 sps:$4 sm:$0xff]  }
  0x43   :  { %v3979_v40 = vld [vmem:[#allocation10 + $0xc0] ss:$16 sps:$4 sm:$0xff]   ;;  %v3987_v42 = vld [vmem:[#allocation10 + $0xa4] ss:$16 sps:$4 sm:$0xff]   ;;  %v3989_v43 = vld [vmem:[#allocation10 + $0xac] ss:$16 sps:$4 sm:$0xff]  }
  0x44   :  { %v3993_v45 = vld [vmem:[#allocation10 + $0xa0] ss:$16 sps:$4 sm:$0xff]   ;;  %v3995_v46 = vld [vmem:[#allocation10 + $0xa8] ss:$16 sps:$4 sm:$0xff]   ;;  %v3999_v47 = vld [vmem:[#allocation10 + $0x84] ss:$16 sps:$4 sm:$0xff]  }
  0x45   :  { %319 = vmatpush1.bf16.msra.mxu0 %v3464_v15  ;;  %392 = vmatpush1.bf16.msra.mxu1 %v3465_v16  ;;  %v4003_v48 = vld [vmem:[#allocation10 + $0x8c] ss:$16 sps:$4 sm:$0xff]   ;;  %v4005_v49 = vld [vmem:[#allocation10 + $0x80] ss:$16 sps:$4 sm:$0xff]   ;;  %v4007_v50 = vld [vmem:[#allocation10 + $0x88] ss:$16 sps:$4 sm:$0xff]  }
  0x46   :  { %320 = vmatprep.subr.bf16.mxu0 %v3466_v17  ;;  %393 = vmatprep.subr.bf16.mxu1 %v3468_v18  ;;  %v4011_v51 = vld [vmem:[#allocation10 + $0x64] ss:$16 sps:$4 sm:$0xff]   ;;  %v4015_v52 = vld [vmem:[#allocation10 + $0x6c] ss:$16 sps:$4 sm:$0xff]   ;;  %v4019_v54 = vld [vmem:[#allocation10 + $0x60] ss:$16 sps:$4 sm:$0xff]  }
  0x47   :  { %v3516_v53 = vld [vmem:[#allocation5 + $0x10] sm:$0xff]   ;;  %v4024_v55 = vld [vmem:[%s4547_s1] sm:$0xff]  ;;  %v4026_v56 = vld [vmem:[#allocation10 + $0x68] ss:$16 sps:$4 sm:$0xff]   ;;  %s3904_s1 = smov [#allocation13]  }
  0x48   :  { %v4028_v57 = vld [vmem:[#allocation10 + $0x44] ss:$16 sps:$4 sm:$0xff]   ;;  %vm3167_vm0 = vcmp.gt.s32.totalorder %v4024_v55, 0  ;;  %v4033_v58 = vld [vmem:[#allocation10 + $0x4c] ss:$16 sps:$4 sm:$0xff]   ;;  %vm3203_vm1 = vcmp.gt.s32.totalorder %v4024_v55, 1 }
  0x49   :  { %321 = vmatpush1.bf16.msra.mxu0 %v3470_v19  ;;  %394 = vmatpush1.bf16.msra.mxu1 %v3471_v20  ;;  %v803_v59 = vsel %vm3167_vm0, 1, %v4553_v0  ;;  %v4039_v60 = vld [vmem:[#allocation10 + $0x40] ss:$16 sps:$4 sm:$0xff]   ;;  %v4041_v61 = vld [vmem:[#allocation10 + $0x48] ss:$16 sps:$4 sm:$0xff]   ;;  %v1122_v1 = vsel %vm3203_vm1, 1, %v4553_v0 }
  0x4a   :  { %322 = vmatprep.subr.bf16.mxu0 %v3472_v21  ;;  %395 = vmatprep.subr.bf16.mxu1 %v3474_v22  ;;  %v4043_v62 = vld [vmem:[#allocation10 + $0x24] ss:$16 sps:$4 sm:$0xff]   ;;  %v4045_v63 = vld [vmem:[#allocation10 + $0x2c] ss:$16 sps:$4 sm:$0xff]   ;;  %v4054_v3 = vld [vmem:[#allocation10 + $0x20] ss:$16 sps:$4 sm:$0xff]  }
  0x4b   :  { %805 = vperm.xlu0 %3440, %v803_v59   ;;  %v3529_v2 = vld [vmem:[#allocation5 + $0x18] sm:$0xff]   ;;  %v4058_v5 = vld [vmem:[#allocation10 + $0x4] ss:$16 sps:$4 sm:$0xff]   ;;  %vm3311_vm2 = vcmp.gt.s32.totalorder %v4024_v55, 4  ;;  %v4067_v7 = vld [vmem:[#allocation10] ss:$16 sps:$4 sm:$0xff]  }
  0x4c   :  { %v4056_v4 = vld [vmem:[#allocation10 + $0x28] ss:$16 sps:$4 sm:$0xff]   ;;  %v4060_v6 = vld [vmem:[#allocation10 + $0xc] ss:$16 sps:$4 sm:$0xff]   ;;  %v2079_v9 = vsel %vm3311_vm2, 1, %v4553_v0  ;;  %vm3383_vm3 = vcmp.gt.s32.totalorder %v4024_v55, 6 }
  0x4d   :  { %323 = vmatpush1.bf16.msra.mxu0 %v3476_v23  ;;  %396 = vmatpush1.bf16.msra.mxu1 %v3477_v24  ;;  %v4069_v8 = vld [vmem:[#allocation10 + $0x8] ss:$16 sps:$4 sm:$0xff]   ;;  %v2717_v10 = vsel %vm3383_vm3, 1, %v4553_v0  ;;  %v4120_v14 = vld [vmem:[#allocation11 + $0x10] sm:$0xff]  ;;  %v124_v17 = vld [vmem:[#allocation11] sm:$0xff]  ;;  %vm3239_vm6 = vcmp.gt.s32.totalorder %v4024_v55, 2 }
  0x4e   :  { %324 = vmatprep.subr.bf16.mxu0 %v3478_v25  ;;  %397 = vmatprep.subr.bf16.mxu1 %v3480_v26  ;;  %v4126_v18 = vld [vmem:[#allocation11 + $0x18] sm:$0xff]  ;;  %v125_v23 = vld [vmem:[#allocation11 + $0x8] sm:$0xff]  ;;  %vm3275_vm7 = vcmp.gt.s32.totalorder %v4024_v55, 3  ;;  %vm3347_vm8 = vcmp.gt.s32.totalorder %v4024_v55, 5  ;;  %vm3419_vm9 = vcmp.gt.s32.totalorder %v4024_v55, 7  ;;  %s3068_s19 = sshll.u32 %s3904_s1, 4  ;;  %s3069_s19 = int_to_ptr.vmem [resolvable:$true] %s3068_s19 }
  0x4f   :  { %1124 = vperm.xlu0 %3440, %v1122_v1   ;;  %s3844_s20 = scalar_lea.vmem %s3069_s19, 1024  ;;  %p3849_p7 = scmp.lt.s32.totalorder %s3069_s19, %s3069_s19 }
  0x50   :  { %p3845_p6 = scmp.ne.s32.totalorder %s3069_s19, %s3844_s20  ;;  %p3850_p8 = scmp.lt.s32.totalorder %s3844_s20, %s3844_s20 }
  0x51   :  { %325 = vmatpush1.bf16.msra.mxu0 %v3482_v27  ;;  %398 = vmatpush1.bf16.msra.mxu1 %v3483_v28 }
  0x52   :  { %326 = vmatprep.subr.bf16.mxu0 %v3484_v29  ;;  %399 = vmatprep.subr.bf16.mxu1 %v3486_v30  ;;  %p3851_p9 = por %p3850_p8, %p3849_p7 }
  0x53   :  { %2081 = vperm.xlu0 %3440, %v2079_v9  }
  0x54   :  { %p3852_p10 = pnand %p3851_p9, %p3845_p6 }
  0x55   :  { %327 = vmatpush1.bf16.msra.mxu0 %v3488_v31  ;;  %400 = vmatpush1.bf16.msra.mxu1 %v3489_v32 }
  0x56   :  { %691 = vmatprep.subr.bf16.mxu0 %v3965_v33  ;;  %732 = vmatprep.subr.bf16.mxu1 %v3967_v34 }
  0x57   :  { %2719 = vperm.xlu0 %3440, %v2717_v10  }
  0x58   :  { %345 = vmatmul.mubr.bf16.vlgmr.msra.gmra.mxu0 %v3490_v35  ;;  %418 = vmatmul.mubr.bf16.vlgmr.msra.gmra.mxu1 %v3490_v35 }
  0x59   :  { %692 = vmatpush1.bf16.msra.mxu0 %v3969_v36  ;;  %733 = vmatpush1.bf16.msra.mxu1 %v3971_v37 }
  0x5a   :  { %693 = vmatprep.subr.bf16.mxu0 %v3975_v38  ;;  %734 = vmatprep.subr.bf16.mxu1 %v3977_v39 }
  0x5b   :  { %354 = vmatprep.mubr.bf16.mxu0 %v4553_v0  ;;  %427 = vmatprep.mubr.bf16.mxu1 %v4553_v0 }
  0x5d   :  { %694 = vmatpush1.bf16.msra.mxu0 %v3979_v40  ;;  %735 = vmatpush1.bf16.msra.mxu1 %v3983_v41 }
  0x5e   :  { %695 = vmatprep.subr.bf16.mxu0 %v3987_v42  ;;  %736 = vmatprep.subr.bf16.mxu1 %v3989_v43 }
  0x60   :  { %355 = vmatmul.mubr.bf16.gmra.mxu0 %v3503_v44  ;;  %428 = vmatmul.mubr.bf16.gmra.mxu1 %v3503_v44 }
  0x61   :  { %696 = vmatpush1.bf16.msra.mxu0 %v3993_v45  ;;  %737 = vmatpush1.bf16.msra.mxu1 %v3995_v46 }
  0x62   :  { %697 = vmatprep.subr.bf16.mxu0 %v3999_v47  ;;  %738 = vmatprep.subr.bf16.mxu1 %v4003_v48 }
  0x63   :  { %364 = vmatprep.mubr.bf16.mxu0 %v4553_v0  ;;  %437 = vmatprep.mubr.bf16.mxu1 %v4553_v0 }
  0x65   :  { %698 = vmatpush1.bf16.msra.mxu0 %v4005_v49  ;;  %739 = vmatpush1.bf16.msra.mxu1 %v4007_v50 }
  0x66   :  { %699 = vmatprep.subr.bf16.mxu0 %v4011_v51  ;;  %740 = vmatprep.subr.bf16.mxu1 %v4015_v52 }
  0x68   :  { %365 = vmatmul.mubr.bf16.gmra.mxu0 %v3516_v53  ;;  %438 = vmatmul.mubr.bf16.gmra.mxu1 %v3516_v53 }
  0x69   :  { %700 = vmatpush1.bf16.msra.mxu0 %v4019_v54  ;;  %741 = vmatpush1.bf16.msra.mxu1 %v4026_v56 }
  0x6a   :  { %701 = vmatprep.subr.bf16.mxu0 %v4028_v57  ;;  %742 = vmatprep.subr.bf16.mxu1 %v4033_v58 }
  0x6b   :  { %374 = vmatprep.mubr.bf16.mxu0 %v4553_v0  ;;  %447 = vmatprep.mubr.bf16.mxu1 %v4553_v0 }
  0x6d   :  { %702 = vmatpush1.bf16.msra.mxu0 %v4039_v60  ;;  %743 = vmatpush1.bf16.msra.mxu1 %v4041_v61 }
  0x6e   :  { %703 = vmatprep.subr.bf16.mxu0 %v4043_v62  ;;  %744 = vmatprep.subr.bf16.mxu1 %v4045_v63 }
  0x70   :  { %375 = vmatmul.mubr.bf16.gmra.mxu0 %v3529_v2  ;;  %448 = vmatmul.mubr.bf16.gmra.mxu1 %v3529_v2 }
  0x71   :  { %704 = vmatpush1.bf16.msra.mxu0 %v4054_v3  ;;  %745 = vmatpush1.bf16.msra.mxu1 %v4056_v4 }
  0x72   :  { %705 = vmatprep.subr.bf16.mxu0 %v4058_v5  ;;  %746 = vmatprep.subr.bf16.mxu1 %v4060_v6 }
  0x73   :  { %723 = vmatprep.mubr.bf16.mxu0 %v4553_v0  ;;  %764 = vmatprep.mubr.bf16.mxu1 %v4553_v0 }
  0x75   :  { %706 = vmatpush1.bf16.msra.mxu0 %v4067_v7  ;;  %747 = vmatpush1.bf16.msra.mxu1 %v4069_v8 }
  0x76   :  { %1009 = vmatprep.subr.bf16.mxu0 %v3965_v33  ;;  %1050 = vmatprep.subr.bf16.mxu1 %v3967_v34 }
  0x78   :  { %724 = vmatmul.mubr.bf16.vlgmr.msra.gmra.mxu0 %v3903_v11  ;;  %765 = vmatmul.mubr.bf16.vlgmr.msra.gmra.mxu1 %v3903_v11 }
  0x79   :  { %1010 = vmatpush1.bf16.msra.mxu0 %v3969_v36  ;;  %1051 = vmatpush1.bf16.msra.mxu1 %v3971_v37 }
  0x7a   :  { %1011 = vmatprep.subr.bf16.mxu0 %v3975_v38  ;;  %1052 = vmatprep.subr.bf16.mxu1 %v3977_v39 }
  0x7b   :  { %1041 = vmatprep.mubr.bf16.mxu0 %v4553_v0  ;;  %1082 = vmatprep.mubr.bf16.mxu1 %v4553_v0 }
  0x7d   :  { %1012 = vmatpush1.bf16.msra.mxu0 %v3979_v40  ;;  %1053 = vmatpush1.bf16.msra.mxu1 %v3983_v41 }
  0x7e   :  { %1013 = vmatprep.subr.bf16.mxu0 %v3987_v42  ;;  %1054 = vmatprep.subr.bf16.mxu1 %v3989_v43 }
  0x81   :  { %1014 = vmatpush1.bf16.msra.mxu0 %v3993_v45  ;;  %1055 = vmatpush1.bf16.msra.mxu1 %v3995_v46 }
  0x82   :  { %1015 = vmatprep.subr.bf16.mxu0 %v3999_v47  ;;  %1056 = vmatprep.subr.bf16.mxu1 %v4003_v48 }
  0x85   :  { %1016 = vmatpush1.bf16.msra.mxu0 %v4005_v49  ;;  %1057 = vmatpush1.bf16.msra.mxu1 %v4007_v50 }
  0x86   :  { %1017 = vmatprep.subr.bf16.mxu0 %v4011_v51  ;;  %1058 = vmatprep.subr.bf16.mxu1 %v4015_v52 }
  0x89   :  { %1018 = vmatpush1.bf16.msra.mxu0 %v4019_v54  ;;  %1059 = vmatpush1.bf16.msra.mxu1 %v4026_v56 }
  0x8a   :  { %1019 = vmatprep.subr.bf16.mxu0 %v4028_v57  ;;  %1060 = vmatprep.subr.bf16.mxu1 %v4033_v58 }
  0x8d   :  { %1020 = vmatpush1.bf16.msra.mxu0 %v4039_v60  ;;  %1061 = vmatpush1.bf16.msra.mxu1 %v4041_v61 }
  0x8e   :  { %1021 = vmatprep.subr.bf16.mxu0 %v4043_v62  ;;  %1062 = vmatprep.subr.bf16.mxu1 %v4045_v63 }
  0x91   :  { %1022 = vmatpush1.bf16.msra.mxu0 %v4054_v3  ;;  %1063 = vmatpush1.bf16.msra.mxu1 %v4056_v4 }
  0x92   :  { %1023 = vmatprep.subr.bf16.mxu0 %v4058_v5  ;;  %1064 = vmatprep.subr.bf16.mxu1 %v4060_v6 }
  0x95   :  { %1024 = vmatpush1.bf16.msra.mxu0 %v4067_v7  ;;  %1065 = vmatpush1.bf16.msra.mxu1 %v4069_v8 }
  0x96   :  { %1328 = vmatprep.subr.bf16.mxu0 %v3965_v33  ;;  %1369 = vmatprep.subr.bf16.mxu1 %v3967_v34 }
 0x118   :  { %v346_v12 = vpop.f32.mrf.mxu0  ;;  %v4118_v13 = vpop.f32.mrf.mxu1 }
 0x11a   :  { %v4122_v15 = vpop.f32.mrf.mxu0  ;;  %v4124_v16 = vpop.f32.mrf.mxu1 }
 0x11c   :  { %v350_v19 = vpop.f32.mrf.mxu0  ;;  %v423_v20 = vpop.f32.mrf.mxu1 }
 0x11d   :  { %v4128_v21 = vadd.f32 %v350_v19, %v124_v17  ;;  %v4131_v22 = vadd.f32 %v423_v20, %v4120_v14 }
 0x11e   :  { %v352_v24 = vpop.f32.mrf.mxu0  ;;  %v425_v25 = vpop.f32.mrf.mxu1 }
 0x11f   :  { %v4133_v26 = vadd.f32 %v352_v24, %v125_v23  ;;  %v4136_v27 = vadd.f32 %v425_v25, %v4126_v18 }
 0x120   :  { %v356_v28 = vpop.f32.mrf.mxu0  ;;  %v429_v29 = vpop.f32.mrf.mxu1 }
 0x121   :  { %v4138_v30 = vadd.f32 %v356_v28, %v124_v17  ;;  %v4141_v31 = vadd.f32 %v429_v29, %v4120_v14 }
 0x122   :  { %v358_v32 = vpop.f32.mrf.mxu0  ;;  %v431_v33 = vpop.f32.mrf.mxu1 }
 0x123   :  { %v4143_v34 = vadd.f32 %v358_v32, %v125_v23  ;;  %v4146_v35 = vadd.f32 %v431_v33, %v4126_v18 }
 0x124   :  { %v360_v44 = vpop.f32.mrf.mxu0  ;;  %v433_v53 = vpop.f32.mrf.mxu1 }
 0x125   :  { %v4148_v59 = vadd.f32 %v360_v44, %v124_v17  ;;  %v4151_v1 = vadd.f32 %v433_v53, %v4120_v14 }
 0x126   :  { %v362_v2 = vpop.f32.mrf.mxu0  ;;  %v435_v9 = vpop.f32.mrf.mxu1 }
 0x127   :  { %4555 = vst [vmem:[#allocation21_spill] sm:$0xff] %v4148_v59  ;;  %4556 = vst [vmem:[#allocation22_spill] sm:$0xff] %v4151_v1  ;;  %v4153_v10 = vadd.f32 %v362_v2, %v125_v23  ;;  %v4156_v11 = vadd.f32 %v435_v9, %v4126_v18 }
 0x128   :  { %v366_v19 = vpop.f32.mrf.mxu0  ;;  %v439_v20 = vpop.f32.mrf.mxu1 }
 0x129   :  { %4557 = vst [vmem:[#allocation23_spill] sm:$0xff] %v4153_v10  ;;  %4558 = vst [vmem:[#allocation24_spill] sm:$0xff] %v4156_v11  ;;  %v4158_v24 = vadd.f32 %v366_v19, %v124_v17  ;;  %v4161_v25 = vadd.f32 %v439_v20, %v4120_v14 }
 0x12a   :  { %v368_v28 = vpop.f32.mrf.mxu0  ;;  %v441_v29 = vpop.f32.mrf.mxu1 }
 0x12b   :  { %4559 = vst [vmem:[#allocation25_spill] sm:$0xff] %v4158_v24  ;;  %4560 = vst [vmem:[#allocation26_spill] sm:$0xff] %v4161_v25  ;;  %v4163_v32 = vadd.f32 %v368_v28, %v125_v23  ;;  %v4166_v33 = vadd.f32 %v441_v29, %v4126_v18 }
 0x12c   :  { %v370_v44 = vpop.f32.mrf.mxu0  ;;  %v443_v53 = vpop.f32.mrf.mxu1 }
 0x12d   :  { %4561 = vst [vmem:[#allocation27_spill] sm:$0xff] %v4163_v32  ;;  %4562 = vst [vmem:[#allocation28_spill] sm:$0xff] %v4166_v33  ;;  %v4168_v2 = vadd.f32 %v370_v44, %v124_v17  ;;  %v4171_v9 = vadd.f32 %v443_v53, %v4120_v14 }
 0x12e   :  { %v372_v0 = vpop.f32.mrf.mxu0  ;;  %v445_v19 = vpop.f32.mrf.mxu1 }
 0x12f   :  { %4563 = vst [vmem:[#allocation29_spill] sm:$0xff] %v4168_v2  ;;  %4564 = vst [vmem:[#allocation30_spill] sm:$0xff] %v4171_v9  ;;  %v4173_v24 = vadd.f32 %v372_v0, %v125_v23  ;;  %v4176_v20 = vadd.f32 %v445_v19, %v4126_v18 }
 0x130   :  { %v376_v25 = vpop.f32.mrf.mxu0  ;;  %v449_v28 = vpop.f32.mrf.mxu1 }
 0x131   :  { %4565 = vst [vmem:[#allocation31_spill] sm:$0xff] %v4173_v24  ;;  %4566 = vst [vmem:[#allocation32_spill] sm:$0xff] %v4176_v20  ;;  %v4178_v32 = vadd.f32 %v376_v25, %v124_v17  ;;  %v4181_v29 = vadd.f32 %v449_v28, %v4120_v14 }
 0x132   :  { %v378_v33 = vpop.f32.mrf.mxu0  ;;  %v451_v44 = vpop.f32.mrf.mxu1 }
 0x133   :  { %4567 = vst [vmem:[#allocation33_spill] sm:$0xff] %v4178_v32  ;;  %4568 = vst [vmem:[#allocation34_spill] sm:$0xff] %v4181_v29  ;;  %v4183_v2 = vadd.f32 %v378_v33, %v125_v23  ;;  %v4186_v53 = vadd.f32 %v451_v44, %v4126_v18  ;;  %v347_v32 = vadd.f32 %v346_v12, %v124_v17 }
 0x134   :  { %v380_v9 = vpop.f32.mrf.mxu0  ;;  %v453_v0 = vpop.f32.mrf.mxu1  ;;  %v349_v44 = vadd.f32 %v4122_v15, %v125_v23 }
 0x135   :  { %4569 = vst [vmem:[#allocation35_spill] sm:$0xff] %v4183_v2  ;;  %4570 = vst [vmem:[#allocation36_spill] sm:$0xff] %v4186_v53  ;;  %v4188_v24 = vadd.f32 %v380_v9, %v124_v17  ;;  %v4191_v19 = vadd.f32 %v453_v0, %v4120_v14  ;;  %v422_v17 = vadd.f32 %v4124_v16, %v4126_v18 }
 0x136   :  { %v382_v20 = vpop.f32.mrf.mxu0  ;;  %v455_v25 = vpop.f32.mrf.mxu1 }
 0x137   :  { %4571 = vst [vmem:[#allocation37_spill] sm:$0xff] %v4188_v24  ;;  %4572 = vst [vmem:[#allocation38_spill] sm:$0xff] %v4191_v19  ;;  %v4193_v1 = vadd.f32 %v382_v20, %v125_v23  ;;  %v4196_v28 = vadd.f32 %v455_v25, %v4126_v18  ;;  %v420_v25 = vadd.f32 %v4118_v13, %v4120_v14  ;;  %v4206_v13 = vpop.permute.xlu0 %805 }
 0x138   :  { %v725_v33 = vpop.f32.mrf.mxu0  ;;  %v766_v29 = vpop.f32.mrf.mxu1  ;;  %vm807_vm4 = vcmp.eq.s32.totalorder %v4206_v13, 1  ;;  %v4292_v13 = vld [vmem:[#allocation10 + $0xc8] ss:$16 sps:$4 sm:$0xff]  }
 0x139   :  { %v773_v53 = vadd.f32 %v725_v33, %v347_v32  ;;  %v775_v32 = vadd.f32 %v766_v29, %v420_v25  ;;  %vm3420_vm5 = vmpackc.low %vm807_vm4, %vm807_vm4 }
 0x13a   :  { %v727_v2 = vpop.f32.mrf.mxu0  ;;  %v768_v11 = vpop.f32.mrf.mxu1 }
 0x13b   :  { %v3164_v9 = vmul.f32 -1.442695, %v773_v53  ;;  %v774_v24 = vadd.f32 %v727_v2, %v349_v44  ;;  %v776_v20 = vadd.f32 %v768_v11, %v422_v17  ;;  %v4573_v17 = vmov 0  }
 0x13c   :  { %v729_v10 = vpop.f32.mrf.mxu0  ;;  %v770_v0 = vpop.f32.mrf.mxu1 }
 0x13d   :  { %3632 = vpow2.f32 %v3164_v9  ;;  %v3165_v19 = vmul.f32 -1.442695, %v774_v24  ;;  %v3166_v15 = vmul.f32 -1.442695, %v776_v20  ;;  %v1125_v20 = vpop.permute.xlu0 %1124 }
 0x13e   :  { %v730_v59 = vpop.f32.mrf.mxu0  ;;  %v771_v12 = vpop.f32.mrf.mxu1  ;;  %vm1126_vm10 = vcmp.eq.s32.totalorder %v1125_v20, 1 }
 0x13f   :  { %3634 = vpow2.f32 %v3165_v19 }
 0x140   :  { %3636 = vpow2.f32 %v3166_v15 }
 0x14a   :  { %v3633_v23 = vpop.eup %3632 }
 0x14b   :  { %v780_v33 = vadd.f32 1.0, %v3633_v23 }
 0x14c   :  { %v3635_v53 = vpop.eup %3634 }
 0x14d   :  { %3638 = vrcp.f32 %v780_v33  ;;  %v786_v10 = vadd.f32 1.0, %v3635_v53  ;;  %v3637_v59 = vpop.eup %3636 }
 0x14e   :  { %3640 = vtanh.f32 %v775_v32  ;;  %v793_v44 = vadd.f32 1.0, %v3637_v59 }
 0x14f   :  { %3642 = vrcp.f32 %v786_v10 }
 0x150   :  { %3644 = vrcp.f32 %v793_v44  ;;  %v4279_v44 = vld [vmem:[#allocation10 + $0xec] ss:$16 sps:$4 sm:$0xff]  }
 0x15a   :  { %v3639_v24 = vpop.eup %3638 }
 0x15b   :  { %v3641_v2 = vpop.eup %3640 }
 0x15c   :  { %v3643_v19 = vpop.eup %3642  ;;  %v797_v18 = vmul.f32 %v3641_v2, %v3639_v24  ;;  %v4273_v24 = vld [vmem:[#allocation10 + $0xe0] ss:$16 sps:$4 sm:$0xff]   ;;  %v4275_v2 = vld [vmem:[#allocation10 + $0xe4] ss:$16 sps:$4 sm:$0xff]  }
 0x15d   :  { %v796_v16 = vmul.f32 0.0, %v3643_v19  ;;  %v3645_v14 = vpop.eup %3644  ;;  %v4277_v19 = vld [vmem:[#allocation10 + $0xe8] ss:$16 sps:$4 sm:$0xff]  }
 0x15f   :  { %v4203_v11 = vadd.f32 %v797_v18, %v796_v16  ;;  %v4281_v16 = vld [vmem:[#allocation10 + $0xc4] ss:$16 sps:$4 sm:$0xff]   ;;  %v4284_v18 = vld [vmem:[#allocation10 + $0xcc] ss:$16 sps:$4 sm:$0xff]  }
 0x161   :  { %3646 = vtanh.f32 %v4203_v11 }
 0x16e   :  { %v3647_v29 = vpop.eup %3646 }
 0x16f   :  { %v800_v9 = vmul.f32 %v3647_v29, %v3645_v14  ;;  %v4301_v14 = vld [vmem:[#allocation10 + $0x84] ss:$16 sps:$4 sm:$0xff]   ;;  %v4303_v29 = vld [vmem:[#allocation10 + $0x8c] ss:$16 sps:$4 sm:$0xff]  }
 0x171   :  { %v4214_v0 = vsel %vm807_vm4, %v800_v9, 0.0  ;;  %v3421_v12 = vpack.c.bf16 %v800_v9, %v800_v9  ;;  %v4305_v9 = vld [vmem:[#allocation10 + $0x80] ss:$16 sps:$4 sm:$0xff]  }
 0x172   :  { %811 = vst [vmem:[#allocation13] sm:$0xff] %v4214_v0 }
 0x173   :  { %3422 = vmatmul.mubr.msk.bf16.vlgmr.msra.gmra.mxu0 %vm3420_vm5, %v3421_v12  ;;  %3425 = vmatmul.mubr.msk.bf16.vlgmr.msra.gmra.mxu1 %vm3420_vm5, %v3421_v12  ;;  %v4325_v12 = vld [vmem:[#allocation10 + $0x44] ss:$16 sps:$4 sm:$0xff]  }
 0x174   :  { %1329 = vmatpush1.bf16.msra.mxu0 %v3969_v36  ;;  %1370 = vmatpush1.bf16.msra.mxu1 %v3971_v37  ;;  %v1441_v36 = vsel %vm3239_vm6, 1, %v4573_v17  ;;  %v1760_v37 = vsel %vm3275_vm7, 1, %v4573_v17 }
 0x175   :  { %1330 = vmatprep.subr.bf16.mxu0 %v3975_v38  ;;  %1371 = vmatprep.subr.bf16.mxu1 %v3977_v39  ;;  %v2398_v38 = vsel %vm3347_vm8, 1, %v4573_v17  ;;  %v3036_v39 = vsel %vm3419_vm9, 1, %v4573_v17 }
 0x176   :  { %1360 = vmatprep.mubr.bf16.mxu0 %v4573_v17  ;;  %1401 = vmatprep.mubr.bf16.mxu1 %v4573_v17 }
 0x177   :  { %1443 = vperm.xlu1 %3441, %v1441_v36   ;;  %v4327_v36 = vld [vmem:[#allocation10 + $0x4c] ss:$16 sps:$4 sm:$0xff]  }
 0x178   :  { %1331 = vmatpush1.bf16.msra.mxu0 %v3979_v40  ;;  %1372 = vmatpush1.bf16.msra.mxu1 %v3983_v41 }
 0x179   :  { %1332 = vmatprep.subr.bf16.mxu0 %v3987_v42  ;;  %1373 = vmatprep.subr.bf16.mxu1 %v3989_v43 }
 0x17b   :  { %1762 = vperm.xlu1 %3441, %v1760_v37   ;;  %v4329_v37 = vld [vmem:[#allocation10 + $0x40] ss:$16 sps:$4 sm:$0xff]  }
 0x17c   :  { %1333 = vmatpush1.bf16.msra.mxu0 %v3993_v45  ;;  %1374 = vmatpush1.bf16.msra.mxu1 %v3995_v46 }
 0x17d   :  { %1334 = vmatprep.subr.bf16.mxu0 %v3999_v47  ;;  %1375 = vmatprep.subr.bf16.mxu1 %v4003_v48 }
 0x17f   :  { %2400 = vperm.xlu1 %3441, %v2398_v38   ;;  %v4331_v38 = vld [vmem:[#allocation10 + $0x48] ss:$16 sps:$4 sm:$0xff]  }
 0x180   :  { %1335 = vmatpush1.bf16.msra.mxu0 %v4005_v49  ;;  %1376 = vmatpush1.bf16.msra.mxu1 %v4007_v50 }
 0x181   :  { %1336 = vmatprep.subr.bf16.mxu0 %v4011_v51  ;;  %1377 = vmatprep.subr.bf16.mxu1 %v4015_v52 }
 0x183   :  { %3038 = vperm.xlu1 %3441, %v3036_v39   ;;  %v4337_v39 = vld [vmem:[#allocation10 + $0x24] ss:$16 sps:$4 sm:$0xff]  }
 0x184   :  { %1337 = vmatpush1.bf16.msra.mxu0 %v4019_v54  ;;  %1378 = vmatpush1.bf16.msra.mxu1 %v4026_v56 }
 0x185   :  { %1338 = vmatprep.subr.bf16.mxu0 %v4028_v57  ;;  %1379 = vmatprep.subr.bf16.mxu1 %v4033_v58 }
 0x188   :  { %1339 = vmatpush1.bf16.msra.mxu0 %v4039_v60  ;;  %1380 = vmatpush1.bf16.msra.mxu1 %v4041_v61 }
 0x189   :  { %1340 = vmatprep.subr.bf16.mxu0 %v4043_v62  ;;  %1381 = vmatprep.subr.bf16.mxu1 %v4045_v63 }
 0x18c   :  { %1341 = vmatpush1.bf16.msra.mxu0 %v4054_v3  ;;  %1382 = vmatpush1.bf16.msra.mxu1 %v4056_v4 }
 0x18d   :  { %1342 = vmatprep.subr.bf16.mxu0 %v4058_v5  ;;  %1383 = vmatprep.subr.bf16.mxu1 %v4060_v6 }
 0x190   :  { %1343 = vmatpush1.bf16.msra.mxu0 %v4067_v7  ;;  %1384 = vmatpush1.bf16.msra.mxu1 %v4069_v8 }
 0x191   :  { %1647 = vmatprep.subr.bf16.mxu0 %v4275_v2  ;;  %1688 = vmatprep.subr.bf16.mxu1 %v4279_v44 }
 0x1f2   :  { %v1444_v20 = vpop.permute.xlu1 %1443 }
 0x1f3   :  { %vm1445_vm11 = vcmp.eq.s32.totalorder %v1444_v20, 1  ;;  %v4577_v20 = vld [vmem:[#allocation22_spill] sm:$0xff] }
 0x233   :  { %v1043_v40 = vpop.f32.mrf.mxu0  ;;  %v1084_v41 = vpop.f32.mrf.mxu1 }
 0x234   :  { %v1091_v47 = vadd.f32 %v1043_v40, %v4128_v21  ;;  %v1093_v60 = vadd.f32 %v1084_v41, %v4131_v22  ;;  %v4339_v40 = vld [vmem:[#allocation10 + $0x2c] ss:$16 sps:$4 sm:$0xff]   ;;  %v4341_v41 = vld [vmem:[#allocation10 + $0x20] ss:$16 sps:$4 sm:$0xff]  }
 0x235   :  { %v1045_v48 = vpop.f32.mrf.mxu0  ;;  %v1086_v49 = vpop.f32.mrf.mxu1 }
 0x236   :  { %v3200_v50 = vmul.f32 -1.442695, %v1091_v47  ;;  %v1092_v51 = vadd.f32 %v1045_v48, %v4133_v26  ;;  %v1094_v55 = vadd.f32 %v1086_v49, %v4136_v27  ;;  %v809_v26 = vsel %vm807_vm4, %v4203_v11, 0.0  ;;  %v4288_v11 = vld [vmem:[#allocation10 + $0xc0] ss:$16 sps:$4 sm:$0xff]  }
 0x237   :  { %v1047_v52 = vpop.f32.mrf.mxu0  ;;  %v1088_v54 = vpop.f32.mrf.mxu1  ;;  %v4343_v47 = vld [vmem:[#allocation10 + $0x28] ss:$16 sps:$4 sm:$0xff]   ;;  %v4349_v48 = vld [vmem:[#allocation10 + $0x4] ss:$16 sps:$4 sm:$0xff]   ;;  %v4351_v49 = vld [vmem:[#allocation10 + $0xc] ss:$16 sps:$4 sm:$0xff]  }
 0x238   :  { %3648 = vpow2.f32 %v3200_v50  ;;  %v3201_v56 = vmul.f32 -1.442695, %v1092_v51  ;;  %v3202_v61 = vmul.f32 -1.442695, %v1094_v55  ;;  %v4353_v50 = vld [vmem:[#allocation10] ss:$16 sps:$4 sm:$0xff]  }
 0x239   :  { %v1048_v57 = vpop.f32.mrf.mxu0  ;;  %v1089_v58 = vpop.f32.mrf.mxu1  ;;  %v4355_v51 = vld [vmem:[#allocation10 + $0x8] ss:$16 sps:$4 sm:$0xff]  }
 0x23a   :  { %3650 = vpow2.f32 %v3201_v56 }
 0x23b   :  { %3652 = vtanh.f32 %v1093_v60 }
 0x23c   :  { %3654 = vpow2.f32 %v3202_v61 }
 0x245   :  { %v3649_v62 = vpop.eup %3648 }
 0x246   :  { %v1098_v63 = vadd.f32 1.0, %v3649_v62 }
 0x247   :  { %v3651_v3 = vpop.eup %3650 }
 0x248   :  { %3656 = vrcp.f32 %v1098_v63  ;;  %v1104_v4 = vadd.f32 1.0, %v3651_v3  ;;  %v3653_v5 = vpop.eup %3652 }
 0x249   :  { %v3655_v6 = vpop.eup %3654 }
 0x24a   :  { %3658 = vrcp.f32 %v1104_v4  ;;  %v1111_v27 = vadd.f32 1.0, %v3655_v6 }
 0x24c   :  { %3660 = vrcp.f32 %v1111_v27 }
 0x255   :  { %v3657_v7 = vpop.eup %3656 }
 0x256   :  { %v1115_v8 = vmul.f32 %v3657_v7, %v3653_v5 }
 0x257   :  { %v3659_v21 = vpop.eup %3658 }
 0x258   :  { %v1114_v22 = vmul.f32 %v3659_v21, %v809_v26 }
 0x259   :  { %v3661_v23 = vpop.eup %3660 }
 0x25a   :  { %v1116_v25 = vadd.f32 %v1115_v8, %v1114_v22 }
 0x25c   :  { %3662 = vtanh.f32 %v1116_v25  ;;  %v4264_v15 = vsel %vm1126_vm10, %v1116_v25, %v809_v26 }
 0x269   :  { %v3663_v32 = vpop.eup %3662 }
 0x26a   :  { %v1118_v33 = vmul.f32 %v3663_v32, %v3661_v23 }
 0x26c   :  { %v4267_v53 = vsel %vm1126_vm10, %v1118_v33, %v4214_v0  ;;  %v1129_v10 = vsel %vm1126_vm10, %v1118_v33, 0.0  ;;  %v4307_v0 = vld [vmem:[#allocation10 + $0x88] ss:$16 sps:$4 sm:$0xff]  }
 0x26d   :  { %1130 = vst [vmem:[#allocation13 + $0x8] sm:$0xff] %v1129_v10  ;;  %v1135_v59 = vpack.c.bf16 %v4267_v53, %v4267_v53 }
 0x26f   :  { %1361 = vmatmul.mubr.bf16.vlgmr.msra.gmra.mxu0 %v1135_v59  ;;  %1402 = vmatmul.mubr.bf16.vlgmr.msra.gmra.mxu1 %v1135_v59 }
 0x270   :  { %1679 = vmatprep.mubr.bf16.mxu0 %v4573_v17  ;;  %1720 = vmatprep.mubr.bf16.mxu1 %v4573_v17 }
 0x271   :  { %1648 = vmatpush1.bf16.msra.mxu0 %v4273_v24  ;;  %1689 = vmatpush1.bf16.msra.mxu1 %v4277_v19 }
 0x272   :  { %1649 = vmatprep.subr.bf16.mxu0 %v4281_v16  ;;  %1690 = vmatprep.subr.bf16.mxu1 %v4284_v18 }
 0x275   :  { %1650 = vmatpush1.bf16.msra.mxu0 %v4288_v11  ;;  %1691 = vmatpush1.bf16.msra.mxu1 %v4292_v13 }
 0x276   :  { %1651 = vmatprep.subr.bf16.mxu0 %v3987_v42  ;;  %1692 = vmatprep.subr.bf16.mxu1 %v3989_v43  ;;  %v4313_v42 = vld [vmem:[#allocation10 + $0x64] ss:$16 sps:$4 sm:$0xff]   ;;  %v4315_v43 = vld [vmem:[#allocation10 + $0x6c] ss:$16 sps:$4 sm:$0xff]  }
 0x279   :  { %1652 = vmatpush1.bf16.msra.mxu0 %v3993_v45  ;;  %1693 = vmatpush1.bf16.msra.mxu1 %v3995_v46  ;;  %v4317_v45 = vld [vmem:[#allocation10 + $0x60] ss:$16 sps:$4 sm:$0xff]   ;;  %v4319_v46 = vld [vmem:[#allocation10 + $0x68] ss:$16 sps:$4 sm:$0xff]  }
 0x27a   :  { %1653 = vmatprep.subr.bf16.mxu0 %v4301_v14  ;;  %1694 = vmatprep.subr.bf16.mxu1 %v4303_v29 }
 0x27d   :  { %1654 = vmatpush1.bf16.msra.mxu0 %v4305_v9  ;;  %1695 = vmatpush1.bf16.msra.mxu1 %v4307_v0 }
 0x27e   :  { %1655 = vmatprep.subr.bf16.mxu0 %v4313_v42  ;;  %1696 = vmatprep.subr.bf16.mxu1 %v4315_v43 }
 0x281   :  { %1656 = vmatpush1.bf16.msra.mxu0 %v4317_v45  ;;  %1697 = vmatpush1.bf16.msra.mxu1 %v4319_v46 }
 0x282   :  { %1657 = vmatprep.subr.bf16.mxu0 %v4325_v12  ;;  %1698 = vmatprep.subr.bf16.mxu1 %v4327_v36 }
 0x285   :  { %1658 = vmatpush1.bf16.msra.mxu0 %v4329_v37  ;;  %1699 = vmatpush1.bf16.msra.mxu1 %v4331_v38 }
 0x286   :  { %1659 = vmatprep.subr.bf16.mxu0 %v4337_v39  ;;  %1700 = vmatprep.subr.bf16.mxu1 %v4339_v40 }
 0x289   :  { %1660 = vmatpush1.bf16.msra.mxu0 %v4341_v41  ;;  %1701 = vmatpush1.bf16.msra.mxu1 %v4343_v47 }
 0x28a   :  { %1661 = vmatprep.subr.bf16.mxu0 %v4349_v48  ;;  %1702 = vmatprep.subr.bf16.mxu1 %v4351_v49 }
 0x28d   :  { %1662 = vmatpush1.bf16.msra.mxu0 %v4353_v50  ;;  %1703 = vmatpush1.bf16.msra.mxu1 %v4355_v51 }
 0x28e   :  { %1966 = vmatprep.subr.bf16.mxu0 %v4275_v2  ;;  %2007 = vmatprep.subr.bf16.mxu1 %v4279_v44 }
 0x32f   :  { %v1362_v52 = vpop.f32.mrf.mxu0  ;;  %v1403_v54 = vpop.f32.mrf.mxu1 }
 0x330   :  { %v1410_v56 = vadd.f32 %v1362_v52, %v4138_v30  ;;  %v1412_v6 = vadd.f32 %v1403_v54, %v4141_v31 }
 0x331   :  { %v1364_v57 = vpop.f32.mrf.mxu0  ;;  %v1405_v58 = vpop.f32.mrf.mxu1 }
 0x332   :  { %v3236_v55 = vmul.f32 -1.442695, %v1410_v56  ;;  %v1411_v60 = vadd.f32 %v1364_v57, %v4143_v34  ;;  %v1413_v5 = vadd.f32 %v1405_v58, %v4146_v35  ;;  %v4388_v58 = vld [vmem:[#allocation10 + $0xa0] ss:$16 sps:$4 sm:$0xff]  }
 0x333   :  { %v1366_v61 = vpop.f32.mrf.mxu0  ;;  %v1407_v62 = vpop.f32.mrf.mxu1 }
 0x334   :  { %3664 = vpow2.f32 %v3236_v55  ;;  %v3237_v63 = vmul.f32 -1.442695, %v1411_v60  ;;  %v3238_v7 = vmul.f32 -1.442695, %v1413_v5  ;;  %v4390_v55 = vld [vmem:[#allocation10 + $0xa8] ss:$16 sps:$4 sm:$0xff]  }
 0x335   :  { %v1367_v3 = vpop.f32.mrf.mxu0  ;;  %v1408_v4 = vpop.f32.mrf.mxu1  ;;  %v4574_v62 = vld [vmem:[#allocation21_spill] sm:$0xff] }
 0x336   :  { %3666 = vpow2.f32 %v3237_v63 }
 0x337   :  { %3668 = vtanh.f32 %v1412_v6  ;;  %v4575_v6 = vld [vmem:[#allocation23_spill] sm:$0xff] }
 0x338   :  { %3670 = vpow2.f32 %v3238_v7 }
 0x341   :  { %v3665_v8 = vpop.eup %3664 }
 0x342   :  { %v1417_v21 = vadd.f32 1.0, %v3665_v8 }
 0x343   :  { %v3667_v30 = vpop.eup %3666 }
 0x344   :  { %3672 = vrcp.f32 %v1417_v21  ;;  %v1423_v26 = vadd.f32 1.0, %v3667_v30  ;;  %v3669_v34 = vpop.eup %3668 }
 0x345   :  { %v3671_v27 = vpop.eup %3670 }
 0x346   :  { %3674 = vrcp.f32 %v1423_v26  ;;  %v1430_v32 = vadd.f32 1.0, %v3671_v27  ;;  %v4576_v27 = vld [vmem:[#allocation24_spill] sm:$0xff] }
 0x348   :  { %3676 = vrcp.f32 %v1430_v32 }
 0x351   :  { %v3673_v22 = vpop.eup %3672 }
 0x352   :  { %v1434_v25 = vmul.f32 %v3673_v22, %v3669_v34 }
 0x353   :  { %v3675_v23 = vpop.eup %3674 }
 0x354   :  { %v1433_v35 = vmul.f32 %v3675_v23, %v4264_v15 }
 0x355   :  { %v3677_v10 = vpop.eup %3676 }
 0x356   :  { %v1435_v31 = vadd.f32 %v1434_v25, %v1433_v35 }
 0x358   :  { %3678 = vtanh.f32 %v1435_v31  ;;  %v4369_v33 = vsel %vm1445_vm11, %v1435_v31, %v4264_v15  ;;  %v4384_v15 = vld [vmem:[#allocation10 + $0xa4] ss:$16 sps:$4 sm:$0xff]  }
 0x365   :  { %v3679_v59 = vpop.eup %3678 }
 0x366   :  { %v1437_v52 = vmul.f32 %v3679_v59, %v3677_v10 }
 0x368   :  { %v4372_v54 = vsel %vm1445_vm11, %v1437_v52, %v4267_v53  ;;  %v1448_v56 = vsel %vm1445_vm11, %v1437_v52, 0.0  ;;  %v4386_v53 = vld [vmem:[#allocation10 + $0xac] ss:$16 sps:$4 sm:$0xff]  }
 0x369   :  { %1449 = vst [vmem:[#allocation13 + $0x10] sm:$0xff] %v1448_v56  ;;  %v1454_v57 = vpack.c.bf16 %v4372_v54, %v4372_v54 }
 0x36b   :  { %1680 = vmatmul.mubr.bf16.vlgmr.msra.gmra.mxu0 %v1454_v57  ;;  %1721 = vmatmul.mubr.bf16.vlgmr.msra.gmra.mxu1 %v1454_v57 }
 0x36c   :  { %1967 = vmatpush1.bf16.msra.mxu0 %v4273_v24  ;;  %2008 = vmatpush1.bf16.msra.mxu1 %v4277_v19 }
 0x36d   :  { %1968 = vmatprep.subr.bf16.mxu0 %v4281_v16  ;;  %2009 = vmatprep.subr.bf16.mxu1 %v4284_v18 }
 0x36e   :  { %1998 = vmatprep.mubr.bf16.mxu0 %v4573_v17  ;;  %2039 = vmatprep.mubr.bf16.mxu1 %v4573_v17 }
 0x370   :  { %1969 = vmatpush1.bf16.msra.mxu0 %v4288_v11  ;;  %2010 = vmatpush1.bf16.msra.mxu1 %v4292_v13 }
 0x371   :  { %1970 = vmatprep.subr.bf16.mxu0 %v4384_v15  ;;  %2011 = vmatprep.subr.bf16.mxu1 %v4386_v53 }
 0x374   :  { %1971 = vmatpush1.bf16.msra.mxu0 %v4388_v58  ;;  %2012 = vmatpush1.bf16.msra.mxu1 %v4390_v55 }
 0x375   :  { %1972 = vmatprep.subr.bf16.mxu0 %v4301_v14  ;;  %2013 = vmatprep.subr.bf16.mxu1 %v4303_v29 }
 0x378   :  { %1973 = vmatpush1.bf16.msra.mxu0 %v4305_v9  ;;  %2014 = vmatpush1.bf16.msra.mxu1 %v4307_v0 }
 0x379   :  { %1974 = vmatprep.subr.bf16.mxu0 %v4313_v42  ;;  %2015 = vmatprep.subr.bf16.mxu1 %v4315_v43 }
 0x37c   :  { %1975 = vmatpush1.bf16.msra.mxu0 %v4317_v45  ;;  %2016 = vmatpush1.bf16.msra.mxu1 %v4319_v46 }
 0x37d   :  { %1976 = vmatprep.subr.bf16.mxu0 %v4325_v12  ;;  %2017 = vmatprep.subr.bf16.mxu1 %v4327_v36 }
 0x380   :  { %1977 = vmatpush1.bf16.msra.mxu0 %v4329_v37  ;;  %2018 = vmatpush1.bf16.msra.mxu1 %v4331_v38 }
 0x381   :  { %1978 = vmatprep.subr.bf16.mxu0 %v4337_v39  ;;  %2019 = vmatprep.subr.bf16.mxu1 %v4339_v40 }
 0x384   :  { %1979 = vmatpush1.bf16.msra.mxu0 %v4341_v41  ;;  %2020 = vmatpush1.bf16.msra.mxu1 %v4343_v47 }
 0x385   :  { %1980 = vmatprep.subr.bf16.mxu0 %v4349_v48  ;;  %2021 = vmatprep.subr.bf16.mxu1 %v4351_v49 }
 0x388   :  { %1981 = vmatpush1.bf16.msra.mxu0 %v4353_v50  ;;  %2022 = vmatpush1.bf16.msra.mxu1 %v4355_v51 }
 0x389   :  { %2285 = vmatprep.subr.bf16.mxu0 %v4275_v2  ;;  %2326 = vmatprep.subr.bf16.mxu1 %v4279_v44 }
 0x42b   :  { %v1681_v60 = vpop.f32.mrf.mxu0  ;;  %v1722_v61 = vpop.f32.mrf.mxu1 }
 0x42c   :  { %v1729_v63 = vadd.f32 %v1681_v60, %v4574_v62  ;;  %v1731_v25 = vadd.f32 %v1722_v61, %v4577_v20 }
 0x42d   :  { %v1683_v3 = vpop.f32.mrf.mxu0  ;;  %v1724_v4 = vpop.f32.mrf.mxu1 }
 0x42e   :  { %v3272_v5 = vmul.f32 -1.442695, %v1729_v63  ;;  %v1730_v7 = vadd.f32 %v1683_v3, %v4575_v6  ;;  %v1732_v22 = vadd.f32 %v1724_v4, %v4576_v27  ;;  %v1763_v3 = vpop.permute.xlu1 %1762 }
 0x42f   :  { %v1685_v8 = vpop.f32.mrf.mxu0  ;;  %v1726_v21 = vpop.f32.mrf.mxu1  ;;  %vm1764_vm12 = vcmp.eq.s32.totalorder %v1763_v3, 1 }
 0x430   :  { %3680 = vpow2.f32 %v3272_v5  ;;  %v3273_v30 = vmul.f32 -1.442695, %v1730_v7  ;;  %v3274_v23 = vmul.f32 -1.442695, %v1732_v22 }
 0x431   :  { %v1686_v26 = vpop.f32.mrf.mxu0  ;;  %v1727_v34 = vpop.f32.mrf.mxu1 }
 0x432   :  { %3682 = vpow2.f32 %v3273_v30  ;;  %v4578_v26 = vld [vmem:[#allocation25_spill] sm:$0xff] }
 0x433   :  { %3684 = vtanh.f32 %v1731_v25  ;;  %v4579_v25 = vld [vmem:[#allocation27_spill] sm:$0xff] }
 0x434   :  { %3686 = vpow2.f32 %v3274_v23 }
 0x43d   :  { %v3681_v32 = vpop.eup %3680 }
 0x43e   :  { %v1736_v35 = vadd.f32 1.0, %v3681_v32 }
 0x43f   :  { %v3683_v31 = vpop.eup %3682 }
 0x440   :  { %3688 = vrcp.f32 %v1736_v35  ;;  %v1742_v10 = vadd.f32 1.0, %v3683_v31  ;;  %v3685_v59 = vpop.eup %3684 }
 0x441   :  { %v3687_v52 = vpop.eup %3686 }
 0x442   :  { %3690 = vrcp.f32 %v1742_v10  ;;  %v1749_v62 = vadd.f32 1.0, %v3687_v52  ;;  %v4580_v52 = vld [vmem:[#allocation28_spill] sm:$0xff] }
 0x444   :  { %3692 = vrcp.f32 %v1749_v62 }
 0x44d   :  { %v3689_v56 = vpop.eup %3688 }
 0x44e   :  { %v1753_v57 = vmul.f32 %v3689_v56, %v3685_v59  ;;  %v4581_v56 = vld [vmem:[#allocation26_spill] sm:$0xff] }
 0x44f   :  { %v3691_v60 = vpop.eup %3690 }
 0x450   :  { %v1752_v63 = vmul.f32 %v3691_v60, %v4369_v33 }
 0x451   :  { %v3693_v5 = vpop.eup %3692 }
 0x452   :  { %v1754_v4 = vadd.f32 %v1753_v57, %v1752_v63 }
 0x454   :  { %3694 = vtanh.f32 %v1754_v4  ;;  %v4424_v61 = vsel %vm1764_vm12, %v1754_v4, %v4369_v33 }
 0x461   :  { %v3695_v6 = vpop.eup %3694 }
 0x462   :  { %v1756_v7 = vmul.f32 %v3695_v6, %v3693_v5 }
 0x464   :  { %v4427_v8 = vsel %vm1764_vm12, %v1756_v7, %v4372_v54  ;;  %v1767_v21 = vsel %vm1764_vm12, %v1756_v7, 0.0 }
 0x465   :  { %1768 = vst [vmem:[#allocation13 + $0x18] sm:$0xff] %v1767_v21  ;;  %v1773_v30 = vpack.c.bf16 %v4427_v8, %v4427_v8 }
 0x467   :  { %1999 = vmatmul.mubr.bf16.vlgmr.msra.gmra.mxu0 %v1773_v30  ;;  %2040 = vmatmul.mubr.bf16.vlgmr.msra.gmra.mxu1 %v1773_v30 }
 0x468   :  { %2286 = vmatpush1.bf16.msra.mxu0 %v4273_v24  ;;  %2327 = vmatpush1.bf16.msra.mxu1 %v4277_v19 }
 0x469   :  { %2287 = vmatprep.subr.bf16.mxu0 %v4281_v16  ;;  %2328 = vmatprep.subr.bf16.mxu1 %v4284_v18 }
 0x46a   :  { %2317 = vmatprep.mubr.bf16.mxu0 %v4573_v17  ;;  %2358 = vmatprep.mubr.bf16.mxu1 %v4573_v17 }
 0x46c   :  { %2288 = vmatpush1.bf16.msra.mxu0 %v4288_v11  ;;  %2329 = vmatpush1.bf16.msra.mxu1 %v4292_v13 }
 0x46d   :  { %2289 = vmatprep.subr.bf16.mxu0 %v4384_v15  ;;  %2330 = vmatprep.subr.bf16.mxu1 %v4386_v53 }
 0x470   :  { %2290 = vmatpush1.bf16.msra.mxu0 %v4388_v58  ;;  %2331 = vmatpush1.bf16.msra.mxu1 %v4390_v55 }
 0x471   :  { %2291 = vmatprep.subr.bf16.mxu0 %v4301_v14  ;;  %2332 = vmatprep.subr.bf16.mxu1 %v4303_v29 }
 0x474   :  { %2292 = vmatpush1.bf16.msra.mxu0 %v4305_v9  ;;  %2333 = vmatpush1.bf16.msra.mxu1 %v4307_v0 }
 0x475   :  { %2293 = vmatprep.subr.bf16.mxu0 %v4313_v42  ;;  %2334 = vmatprep.subr.bf16.mxu1 %v4315_v43 }
 0x478   :  { %2294 = vmatpush1.bf16.msra.mxu0 %v4317_v45  ;;  %2335 = vmatpush1.bf16.msra.mxu1 %v4319_v46 }
 0x479   :  { %2295 = vmatprep.subr.bf16.mxu0 %v4325_v12  ;;  %2336 = vmatprep.subr.bf16.mxu1 %v4327_v36 }
 0x47c   :  { %2296 = vmatpush1.bf16.msra.mxu0 %v4329_v37  ;;  %2337 = vmatpush1.bf16.msra.mxu1 %v4331_v38 }
 0x47d   :  { %2297 = vmatprep.subr.bf16.mxu0 %v4337_v39  ;;  %2338 = vmatprep.subr.bf16.mxu1 %v4339_v40 }
 0x480   :  { %2298 = vmatpush1.bf16.msra.mxu0 %v4341_v41  ;;  %2339 = vmatpush1.bf16.msra.mxu1 %v4343_v47 }
 0x481   :  { %2299 = vmatprep.subr.bf16.mxu0 %v4349_v48  ;;  %2340 = vmatprep.subr.bf16.mxu1 %v4351_v49 }
 0x484   :  { %2300 = vmatpush1.bf16.msra.mxu0 %v4353_v50  ;;  %2341 = vmatpush1.bf16.msra.mxu1 %v4355_v51 }
 0x485   :  { %2604 = vmatprep.subr.bf16.mxu0 %v4275_v2  ;;  %2645 = vmatprep.subr.bf16.mxu1 %v4279_v44 }
 0x527   :  { %v2000_v33 = vpop.f32.mrf.mxu0  ;;  %v2041_v54 = vpop.f32.mrf.mxu1 }
 0x528   :  { %v2048_v34 = vadd.f32 %v2000_v33, %v4578_v26  ;;  %v2050_v44 = vadd.f32 %v2041_v54, %v4581_v56  ;;  %v2082_v26 = vpop.permute.xlu0 %2081 }
 0x529   :  { %v2002_v27 = vpop.f32.mrf.mxu0  ;;  %v2043_v22 = vpop.f32.mrf.mxu1  ;;  %vm2083_vm13 = vcmp.eq.s32.totalorder %v2082_v26, 1  ;;  %v3602_v26 = vld [vmem:[#allocation10 + $0x80] ss:$16 sps:$4 sm:$0xff]  }
 0x52a   :  { %v3308_v20 = vmul.f32 -1.442695, %v2048_v34  ;;  %v2049_v23 = vadd.f32 %v2002_v27, %v4579_v25  ;;  %v2051_v2 = vadd.f32 %v2043_v22, %v4580_v52 }
 0x52b   :  { %v2004_v32 = vpop.f32.mrf.mxu0  ;;  %v2045_v35 = vpop.f32.mrf.mxu1 }
 0x52c   :  { %3696 = vpow2.f32 %v3308_v20  ;;  %v3309_v31 = vmul.f32 -1.442695, %v2049_v23  ;;  %v3310_v57 = vmul.f32 -1.442695, %v2051_v2 }
 0x52d   :  { %v2005_v10 = vpop.f32.mrf.mxu0  ;;  %v2046_v59 = vpop.f32.mrf.mxu1 }
 0x52e   :  { %3698 = vpow2.f32 %v3309_v31  ;;  %v2401_v10 = vpop.permute.xlu1 %2400 }
 0x52f   :  { %3700 = vtanh.f32 %v2050_v44  ;;  %vm2402_vm14 = vcmp.eq.s32.totalorder %v2401_v10, 1 }
 0x530   :  { %3702 = vpow2.f32 %v3310_v57 }
 0x539   :  { %v3697_v60 = vpop.eup %3696 }
 0x53a   :  { %v2055_v62 = vadd.f32 1.0, %v3697_v60 }
 0x53b   :  { %v3699_v63 = vpop.eup %3698 }
 0x53c   :  { %3704 = vrcp.f32 %v2055_v62  ;;  %v2061_v3 = vadd.f32 1.0, %v3699_v63  ;;  %v3701_v4 = vpop.eup %3700  ;;  %v3592_v63 = vld [vmem:[#allocation10 + $0xe4] ss:$16 sps:$4 sm:$0xff]  }
 0x53d   :  { %v3703_v5 = vpop.eup %3702 }
 0x53e   :  { %3706 = vrcp.f32 %v2061_v3  ;;  %v2068_v30 = vadd.f32 1.0, %v3703_v5  ;;  %v3595_v3 = vld [vmem:[#allocation10 + $0xec] ss:$16 sps:$4 sm:$0xff]   ;;  %v3593_v5 = vld [vmem:[#allocation10 + $0xe8] ss:$16 sps:$4 sm:$0xff]  }
 0x540   :  { %3708 = vrcp.f32 %v2068_v30  ;;  %v3599_v30 = vld [vmem:[#allocation10 + $0xc8] ss:$16 sps:$4 sm:$0xff]  }
 0x549   :  { %v3705_v6 = vpop.eup %3704 }
 0x54a   :  { %v2072_v7 = vmul.f32 %v3705_v6, %v3701_v4  ;;  %v3590_v4 = vld [vmem:[#allocation10 + $0xe0] ss:$16 sps:$4 sm:$0xff]   ;;  %v3598_v6 = vld [vmem:[#allocation10 + $0xc4] ss:$16 sps:$4 sm:$0xff]  }
 0x54b   :  { %v3707_v21 = vpop.eup %3706 }
 0x54c   :  { %v2071_v33 = vmul.f32 %v3707_v21, %v4424_v61  ;;  %v3596_v21 = vld [vmem:[#allocation10 + $0xc0] ss:$16 sps:$4 sm:$0xff]  }
 0x54d   :  { %v3709_v27 = vpop.eup %3708 }
 0x54e   :  { %v2073_v34 = vadd.f32 %v2072_v7, %v2071_v33  ;;  %v3601_v7 = vld [vmem:[#allocation10 + $0xcc] ss:$16 sps:$4 sm:$0xff]  }
 0x54f   :  { %v3607_v33 = vld [vmem:[#allocation10 + $0x8c] ss:$16 sps:$4 sm:$0xff]  }
 0x550   :  { %3710 = vtanh.f32 %v2073_v34  ;;  %v4471_v54 = vsel %vm2083_vm13, %v2073_v34, %v4424_v61  ;;  %v3605_v34 = vld [vmem:[#allocation10 + $0x88] ss:$16 sps:$4 sm:$0xff]  }
 0x55d   :  { %v3711_v22 = vpop.eup %3710 }
 0x55e   :  { %v2075_v20 = vmul.f32 %v3711_v22, %v3709_v27  ;;  %v3608_v27 = vld [vmem:[#allocation10 + $0x60] ss:$16 sps:$4 sm:$0xff]   ;;  %v3611_v22 = vld [vmem:[#allocation10 + $0x68] ss:$16 sps:$4 sm:$0xff]  }
 0x560   :  { %v4474_v25 = vsel %vm2083_vm13, %v2075_v20, %v4427_v8  ;;  %v2086_v23 = vsel %vm2083_vm13, %v2075_v20, 0.0  ;;  %v3613_v20 = vld [vmem:[#allocation10 + $0x6c] ss:$16 sps:$4 sm:$0xff]  }
 0x561   :  { %2087 = vst [vmem:[#allocation13 + $0x20] sm:$0xff] %v2086_v23  ;;  %v2092_v32 = vpack.c.bf16 %v4474_v25, %v4474_v25  ;;  %v3625_v23 = vld [vmem:[#allocation10 + $0x2c] ss:$16 sps:$4 sm:$0xff]  }
 0x563   :  { %2318 = vmatmul.mubr.bf16.vlgmr.msra.gmra.mxu0 %v2092_v32  ;;  %2359 = vmatmul.mubr.bf16.vlgmr.msra.gmra.mxu1 %v2092_v32  ;;  %v3620_v32 = vld [vmem:[#allocation10 + $0x20] ss:$16 sps:$4 sm:$0xff]  }
 0x564   :  { %2605 = vmatpush1.bf16.msra.mxu0 %v4273_v24  ;;  %2646 = vmatpush1.bf16.msra.mxu1 %v4277_v19 }
 0x565   :  { %2606 = vmatprep.subr.bf16.mxu0 %v4281_v16  ;;  %2647 = vmatprep.subr.bf16.mxu1 %v4284_v18  ;;  %v4582_v16 = vld [vmem:[#allocation29_spill] sm:$0xff] }
 0x566   :  { %2636 = vmatprep.mubr.bf16.mxu0 %v4573_v17  ;;  %2677 = vmatprep.mubr.bf16.mxu1 %v4573_v17 }
 0x568   :  { %2607 = vmatpush1.bf16.msra.mxu0 %v4288_v11  ;;  %2648 = vmatpush1.bf16.msra.mxu1 %v4292_v13 }
 0x569   :  { %2608 = vmatprep.subr.bf16.mxu0 %v4384_v15  ;;  %2649 = vmatprep.subr.bf16.mxu1 %v4386_v53 }
 0x56c   :  { %2609 = vmatpush1.bf16.msra.mxu0 %v4388_v58  ;;  %2650 = vmatpush1.bf16.msra.mxu1 %v4390_v55 }
 0x56d   :  { %2610 = vmatprep.subr.bf16.mxu0 %v4301_v14  ;;  %2651 = vmatprep.subr.bf16.mxu1 %v4303_v29  ;;  %v4583_v29 = vld [vmem:[#allocation31_spill] sm:$0xff] }
 0x570   :  { %2611 = vmatpush1.bf16.msra.mxu0 %v4305_v9  ;;  %2652 = vmatpush1.bf16.msra.mxu1 %v4307_v0 }
 0x571   :  { %2612 = vmatprep.subr.bf16.mxu0 %v4313_v42  ;;  %2653 = vmatprep.subr.bf16.mxu1 %v4315_v43 }
 0x574   :  { %2613 = vmatpush1.bf16.msra.mxu0 %v4317_v45  ;;  %2654 = vmatpush1.bf16.msra.mxu1 %v4319_v46 }
 0x575   :  { %2614 = vmatprep.subr.bf16.mxu0 %v4325_v12  ;;  %2655 = vmatprep.subr.bf16.mxu1 %v4327_v36  ;;  %v4584_v12 = vld [vmem:[#allocation32_spill] sm:$0xff] }
 0x578   :  { %2615 = vmatpush1.bf16.msra.mxu0 %v4329_v37  ;;  %2656 = vmatpush1.bf16.msra.mxu1 %v4331_v38  ;;  %v4585_v37 = vld [vmem:[#allocation30_spill] sm:$0xff] }
 0x579   :  { %2616 = vmatprep.subr.bf16.mxu0 %v4337_v39  ;;  %2657 = vmatprep.subr.bf16.mxu1 %v4339_v40 }
 0x57c   :  { %2617 = vmatpush1.bf16.msra.mxu0 %v4341_v41  ;;  %2658 = vmatpush1.bf16.msra.mxu1 %v4343_v47 }
 0x57d   :  { %2618 = vmatprep.subr.bf16.mxu0 %v4349_v48  ;;  %2659 = vmatprep.subr.bf16.mxu1 %v4351_v49 }
 0x580   :  { %2619 = vmatpush1.bf16.msra.mxu0 %v4353_v50  ;;  %2660 = vmatpush1.bf16.msra.mxu1 %v4355_v51 }
 0x581   :  { %2923 = vmatprep.subr.bf16.mxu0 %v3592_v63  ;;  %2964 = vmatprep.subr.bf16.mxu1 %v3595_v3 }
 0x623   :  { %v2319_v24 = vpop.f32.mrf.mxu0  ;;  %v2360_v19 = vpop.f32.mrf.mxu1 }
 0x624   :  { %v2367_v18 = vadd.f32 %v2319_v24, %v4582_v16  ;;  %v2369_v38 = vadd.f32 %v2360_v19, %v4585_v37  ;;  %v3623_v24 = vld [vmem:[#allocation10 + $0x28] ss:$16 sps:$4 sm:$0xff]   ;;  %v3628_v19 = vld [vmem:[#allocation10 + $0x4] ss:$16 sps:$4 sm:$0xff]   ;;  %v3631_v16 = vld [vmem:[#allocation10 + $0xc] ss:$16 sps:$4 sm:$0xff]  }
 0x625   :  { %v2321_v11 = vpop.f32.mrf.mxu0  ;;  %v2362_v13 = vpop.f32.mrf.mxu1 }
 0x626   :  { %v3344_v14 = vmul.f32 -1.442695, %v2367_v18  ;;  %v2368_v9 = vadd.f32 %v2321_v11, %v4583_v29  ;;  %v2370_v36 = vadd.f32 %v2362_v13, %v4584_v12  ;;  %v3626_v18 = vld [vmem:[#allocation10] ss:$16 sps:$4 sm:$0xff]   ;;  %v3629_v11 = vld [vmem:[#allocation10 + $0x8] ss:$16 sps:$4 sm:$0xff]  }
 0x627   :  { %v2323_v0 = vpop.f32.mrf.mxu0  ;;  %v2364_v42 = vpop.f32.mrf.mxu1  ;;  %v4586_v29 = vld [vmem:[#allocation33_spill] sm:$0xff] }
 0x628   :  { %3712 = vpow2.f32 %v3344_v14  ;;  %v3345_v43 = vmul.f32 -1.442695, %v2368_v9  ;;  %v3346_v39 = vmul.f32 -1.442695, %v2370_v36 }
 0x629   :  { %v2324_v45 = vpop.f32.mrf.mxu0  ;;  %v2365_v46 = vpop.f32.mrf.mxu1 }
 0x62a   :  { %3714 = vpow2.f32 %v3345_v43  ;;  %v4587_v45 = vld [vmem:[#allocation35_spill] sm:$0xff] }
 0x62b   :  { %3716 = vtanh.f32 %v2369_v38 }
 0x62c   :  { %3718 = vpow2.f32 %v3346_v39 }
 0x635   :  { %v3713_v40 = vpop.eup %3712 }
 0x636   :  { %v2374_v41 = vadd.f32 1.0, %v3713_v40  ;;  %v4588_v40 = vld [vmem:[#allocation36_spill] sm:$0xff] }
 0x637   :  { %v3715_v47 = vpop.eup %3714 }
 0x638   :  { %3720 = vrcp.f32 %v2374_v41  ;;  %v2380_v48 = vadd.f32 1.0, %v3715_v47  ;;  %v3717_v49 = vpop.eup %3716  ;;  %v4589_v47 = vld [vmem:[#allocation34_spill] sm:$0xff] }
 0x639   :  { %v3719_v50 = vpop.eup %3718 }
 0x63a   :  { %3722 = vrcp.f32 %v2380_v48  ;;  %v2387_v35 = vadd.f32 1.0, %v3719_v50 }
 0x63c   :  { %3724 = vrcp.f32 %v2387_v35 }
 0x645   :  { %v3721_v51 = vpop.eup %3720 }
 0x646   :  { %v2391_v61 = vmul.f32 %v3721_v51, %v3717_v49 }
 0x647   :  { %v3723_v8 = vpop.eup %3722 }
 0x648   :  { %v2390_v31 = vmul.f32 %v3723_v8, %v4471_v54 }
 0x649   :  { %v3725_v2 = vpop.eup %3724 }
 0x64a   :  { %v2392_v59 = vadd.f32 %v2391_v61, %v2390_v31 }
 0x64c   :  { %3726 = vtanh.f32 %v2392_v59  ;;  %v4516_v52 = vsel %vm2402_vm14, %v2392_v59, %v4471_v54  ;;  %v3610_v54 = vld [vmem:[#allocation10 + $0x64] ss:$16 sps:$4 sm:$0xff]  }
 0x659   :  { %v3727_v56 = vpop.eup %3726 }
 0x65a   :  { %v2394_v44 = vmul.f32 %v3727_v56, %v3725_v2 }
 0x65c   :  { %v4519_v57 = vsel %vm2402_vm14, %v2394_v44, %v4474_v25  ;;  %v2405_v60 = vsel %vm2402_vm14, %v2394_v44, 0.0  ;;  %v3619_v25 = vld [vmem:[#allocation10 + $0x4c] ss:$16 sps:$4 sm:$0xff]   ;;  %v2720_v44 = vpop.permute.xlu0 %2719 }
 0x65d   :  { %2406 = vst [vmem:[#allocation13 + $0x28] sm:$0xff] %v2405_v60  ;;  %v2411_v62 = vpack.c.bf16 %v4519_v57, %v4519_v57  ;;  %vm2721_vm15 = vcmp.eq.s32.totalorder %v2720_v44, 1 }
 0x65f   :  { %2637 = vmatmul.mubr.bf16.vlgmr.msra.gmra.mxu0 %v2411_v62  ;;  %2678 = vmatmul.mubr.bf16.vlgmr.msra.gmra.mxu1 %v2411_v62 }
 0x660   :  { %2955 = vmatprep.mubr.bf16.mxu0 %v4573_v17  ;;  %2996 = vmatprep.mubr.bf16.mxu1 %v4573_v17  ;;  %v3604_v17 = vld [vmem:[#allocation10 + $0x84] ss:$16 sps:$4 sm:$0xff]  }
 0x661   :  { %2924 = vmatpush1.bf16.msra.mxu0 %v3590_v4  ;;  %2965 = vmatpush1.bf16.msra.mxu1 %v3593_v5 }
 0x662   :  { %2925 = vmatprep.subr.bf16.mxu0 %v3598_v6  ;;  %2966 = vmatprep.subr.bf16.mxu1 %v3601_v7 }
 0x665   :  { %2926 = vmatpush1.bf16.msra.mxu0 %v3596_v21  ;;  %2967 = vmatpush1.bf16.msra.mxu1 %v3599_v30 }
 0x666   :  { %2927 = vmatprep.subr.bf16.mxu0 %v4384_v15  ;;  %2968 = vmatprep.subr.bf16.mxu1 %v4386_v53  ;;  %v3616_v15 = vld [vmem:[#allocation10 + $0x44] ss:$16 sps:$4 sm:$0xff]   ;;  %v3614_v53 = vld [vmem:[#allocation10 + $0x40] ss:$16 sps:$4 sm:$0xff]  }
 0x669   :  { %2928 = vmatpush1.bf16.msra.mxu0 %v4388_v58  ;;  %2969 = vmatpush1.bf16.msra.mxu1 %v4390_v55  ;;  %v3617_v58 = vld [vmem:[#allocation10 + $0x48] ss:$16 sps:$4 sm:$0xff]   ;;  %v3622_v55 = vld [vmem:[#allocation10 + $0x24] ss:$16 sps:$4 sm:$0xff]  }
 0x66a   :  { %2929 = vmatprep.subr.bf16.mxu0 %v3604_v17  ;;  %2970 = vmatprep.subr.bf16.mxu1 %v3607_v33  ;;  %v4590_v33 = vld [vmem:[#allocation37_spill] sm:$0xff] }
 0x66d   :  { %2930 = vmatpush1.bf16.msra.mxu0 %v3602_v26  ;;  %2971 = vmatpush1.bf16.msra.mxu1 %v3605_v34 }
 0x66e   :  { %2931 = vmatprep.subr.bf16.mxu0 %v3610_v54  ;;  %2972 = vmatprep.subr.bf16.mxu1 %v3613_v20 }
 0x671   :  { %2932 = vmatpush1.bf16.msra.mxu0 %v3608_v27  ;;  %2973 = vmatpush1.bf16.msra.mxu1 %v3611_v22 }
 0x672   :  { %2933 = vmatprep.subr.bf16.mxu0 %v3616_v15  ;;  %2974 = vmatprep.subr.bf16.mxu1 %v3619_v25 }
 0x675   :  { %2934 = vmatpush1.bf16.msra.mxu0 %v3614_v53  ;;  %2975 = vmatpush1.bf16.msra.mxu1 %v3617_v58  ;;  %v4591_v58 = vld [vmem:[#allocation38_spill] sm:$0xff] }
 0x676   :  { %2935 = vmatprep.subr.bf16.mxu0 %v3622_v55  ;;  %2976 = vmatprep.subr.bf16.mxu1 %v3625_v23 }
 0x679   :  { %2936 = vmatpush1.bf16.msra.mxu0 %v3620_v32  ;;  %2977 = vmatpush1.bf16.msra.mxu1 %v3623_v24 }
 0x67a   :  { %2937 = vmatprep.subr.bf16.mxu0 %v3628_v19  ;;  %2978 = vmatprep.subr.bf16.mxu1 %v3631_v16 }
 0x67d   :  { %2938 = vmatpush1.bf16.msra.mxu0 %v3626_v18  ;;  %2979 = vmatpush1.bf16.msra.mxu1 %v3629_v11 }
 0x71f   :  { %v2638_v13 = vpop.f32.mrf.mxu0  ;;  %v2679_v14 = vpop.f32.mrf.mxu1 }
 0x720   :  { %v2686_v9 = vadd.f32 %v2638_v13, %v4586_v29  ;;  %v2688_v48 = vadd.f32 %v2679_v14, %v4589_v47 }
 0x721   :  { %v2640_v0 = vpop.f32.mrf.mxu0  ;;  %v2681_v42 = vpop.f32.mrf.mxu1 }
 0x722   :  { %v3380_v43 = vmul.f32 -1.442695, %v2686_v9  ;;  %v2687_v46 = vadd.f32 %v2640_v0, %v4587_v45  ;;  %v2689_v41 = vadd.f32 %v2681_v42, %v4588_v40  ;;  %v3039_v42 = vpop.permute.xlu1 %3038 }
 0x723   :  { %v2642_v12 = vpop.f32.mrf.mxu0  ;;  %v2683_v36 = vpop.f32.mrf.mxu1  ;;  %vm3040_vm0 = vcmp.eq.s32.totalorder %v3039_v42, 1 }
 0x724   :  { %3728 = vpow2.f32 %v3380_v43  ;;  %v3381_v37 = vmul.f32 -1.442695, %v2687_v46  ;;  %v3382_v49 = vmul.f32 -1.442695, %v2689_v41 }
 0x725   :  { %v2643_v38 = vpop.f32.mrf.mxu0  ;;  %v2684_v39 = vpop.f32.mrf.mxu1 }
 0x726   :  { %3730 = vpow2.f32 %v3381_v37 }
 0x727   :  { %3732 = vtanh.f32 %v2688_v48 }
 0x728   :  { %3734 = vpow2.f32 %v3382_v49 }
 0x731   :  { %v3729_v50 = vpop.eup %3728 }
 0x732   :  { %v2693_v51 = vadd.f32 1.0, %v3729_v50 }
 0x733   :  { %v3731_v61 = vpop.eup %3730 }
 0x734   :  { %3736 = vrcp.f32 %v2693_v51  ;;  %v2699_v8 = vadd.f32 1.0, %v3731_v61  ;;  %v3733_v35 = vpop.eup %3732 }
 0x735   :  { %v3735_v31 = vpop.eup %3734 }
 0x736   :  { %3738 = vrcp.f32 %v2699_v8  ;;  %v2706_v56 = vadd.f32 1.0, %v3735_v31 }
 0x738   :  { %3740 = vrcp.f32 %v2706_v56 }
 0x741   :  { %v3737_v10 = vpop.eup %3736 }
 0x742   :  { %v2710_v59 = vmul.f32 %v3737_v10, %v3733_v35 }
 0x743   :  { %v3739_v2 = vpop.eup %3738 }
 0x744   :  { %v2709_v60 = vmul.f32 %v3739_v2, %v4516_v52 }
 0x745   :  { %v3741_v3 = vpop.eup %3740 }
 0x746   :  { %v2711_v62 = vadd.f32 %v2710_v59, %v2709_v60 }
 0x748   :  { %3742 = vtanh.f32 %v2711_v62  ;;  %v2723_v63 = vsel %vm2721_vm15, %v2711_v62, %v4516_v52 }
 0x755   :  { %v3743_v4 = vpop.eup %3742 }
 0x756   :  { %v2713_v5 = vmul.f32 %v3743_v4, %v3741_v3 }
 0x758   :  { %v2722_v6 = vsel %vm2721_vm15, %v2713_v5, %v4519_v57  ;;  %v2724_v7 = vsel %vm2721_vm15, %v2713_v5, 0.0 }
 0x759   :  { %2725 = vst [vmem:[#allocation13 + $0x30] sm:$0xff] %v2724_v7  ;;  %v2730_v21 = vpack.c.bf16 %v2722_v6, %v2722_v6 }
 0x75b   :  { %2956 = vmatmul.mubr.bf16.vlgmr.msra.gmra.mxu0 %v2730_v21  ;;  %2997 = vmatmul.mubr.bf16.vlgmr.msra.gmra.mxu1 %v2730_v21 }
 0x81b   :  { %v2957_v30 = vpop.f32.mrf.mxu0  ;;  %v2998_v17 = vpop.f32.mrf.mxu1 }
 0x81c   :  { %v3005_v26 = vadd.f32 %v2957_v30, %v4590_v33  ;;  %v3007_v55 = vadd.f32 %v2998_v17, %v4591_v58 }
 0x81d   :  { %v2959_v34 = vpop.f32.mrf.mxu0  ;;  %v3000_v54 = vpop.f32.mrf.mxu1 }
 0x81e   :  { %v3416_v27 = vmul.f32 -1.442695, %v3005_v26  ;;  %v3006_v22 = vadd.f32 %v2959_v34, %v4193_v1  ;;  %v3008_v53 = vadd.f32 %v3000_v54, %v4196_v28 }
 0x81f   :  { %v2961_v52 = vpop.f32.mrf.mxu0  ;;  %v3002_v20 = vpop.f32.mrf.mxu1 }
 0x820   :  { %3744 = vpow2.f32 %v3416_v27  ;;  %v3417_v15 = vmul.f32 -1.442695, %v3006_v22  ;;  %v3418_v23 = vmul.f32 -1.442695, %v3008_v53 }
 0x821   :  { %v2962_v25 = vpop.f32.mrf.mxu0  ;;  %v3003_v57 = vpop.f32.mrf.mxu1 }
 0x822   :  { %3746 = vpow2.f32 %v3417_v15 }
 0x823   :  { %3748 = vtanh.f32 %v3007_v55 }
 0x824   :  { %3750 = vpow2.f32 %v3418_v23 }
 0x82d   :  { %v3745_v32 = vpop.eup %3744 }
 0x82e   :  { %v3012_v24 = vadd.f32 1.0, %v3745_v32 }
 0x82f   :  { %v3747_v19 = vpop.eup %3746 }
 0x830   :  { %3752 = vrcp.f32 %v3012_v24  ;;  %v3018_v16 = vadd.f32 1.0, %v3747_v19  ;;  %v3749_v1 = vpop.eup %3748 }
 0x831   :  { %v3751_v18 = vpop.eup %3750 }
 0x832   :  { %3754 = vrcp.f32 %v3018_v16  ;;  %v3025_v29 = vadd.f32 1.0, %v3751_v18 }
 0x834   :  { %3756 = vrcp.f32 %v3025_v29 }
 0x83d   :  { %v3753_v11 = vpop.eup %3752 }
 0x83e   :  { %v3029_v13 = vmul.f32 %v3753_v11, %v3749_v1 }
 0x83f   :  { %v3755_v14 = vpop.eup %3754 }
 0x840   :  { %v3028_v9 = vmul.f32 %v3755_v14, %v2723_v63 }
 0x841   :  { %v3757_v28 = vpop.eup %3756 }
 0x842   :  { %v3030_v0 = vadd.f32 %v3029_v13, %v3028_v9 }
 0x844   :  { %3758 = vtanh.f32 %v3030_v0 }
 0x851   :  { %v3759_v43 = vpop.eup %3758 }
 0x852   :  { %v3032_v45 = vmul.f32 %v3759_v43, %v3757_v28 }
 0x854   :  { %v3041_v46 = vsel %vm3040_vm0, %v3032_v45, %v2722_v6  ;;  %v3043_v12 = vsel %vm3040_vm0, %v3032_v45, 0.0 }
 0x855   :  { %3044 = vst [vmem:[#allocation13 + $0x38] sm:$0xff] %v3043_v12  ;;  %v3050_v36 = vmul.f32 %v3041_v46, %v3041_v46 }
 0x857   :  { %3051 = vadd.xlane.f32.xlu0 %v3050_v36 }
 0x858   :  { %3855 = shalt.err (!%p3852_p10)
}
 0x859   :  { %s3905_s21 = smov 128   ;;  %s3906_s22 = smov 8  }
 0x85a   :  { %3074 = dma.vmem_to_hbm [thread:$0]  %s3069_s19, 1024, %s4551_s5, [#allocation7], %s3905_s21, %s3905_s21, %s3906_s22  }
 0x85b   :  { %s3907_s25 = smov [#allocation14]  }
 0x85c   :  { %s3081_s26 = sshll.u32 %s3907_s25, 4  ;;  %s3082_s26 = int_to_ptr.vmem [resolvable:$true] %s3081_s26 }
 0x85d   :  { %s3864_s27 = scalar_lea.vmem %s3082_s26, 128  ;;  %p3869_p12 = scmp.lt.s32.totalorder %s3082_s26, %s3082_s26 }
 0x85e   :  { %p3865_p11 = scmp.ne.s32.totalorder %s3082_s26, %s3864_s27  ;;  %p3870_p13 = scmp.lt.s32.totalorder %s3864_s27, %s3864_s27 }
 0x860   :  { %p3871_p0 = por %p3870_p13, %p3869_p12 }
 0x862   :  { %p3872_p1 = pnand %p3871_p0, %p3865_p11 }
 0x8e0   :  { %v3052_v37 = vpop.xlane.xlu0 %3051 }
 0x8e1   :  { %3760 = vrsqrt.f32 %v3052_v37  ;;  %vm3055_vm1 = vcmp.eq.f32.partialorder %v3052_v37, inf  ;;  %v3058_v40 = vand.u32 2147483648, %v3052_v37  ;;  %vm3057_vm2 = vcmp.eq.f32.partialorder %v3052_v37, 0.0 }
 0x8ee   :  { %v3761_v38 = vpop.eup %3760 }
 0x8ef   :  { %v3054_v39 = vmul.f32 %v3761_v38, %v3052_v37 }
 0x8f1   :  { %v3056_v41 = vsel %vm3055_vm1, %v3052_v37, %v3054_v39 }
 0x8f2   :  { %v3059_v47 = vsel %vm3057_vm2, %v3058_v40, %v3056_v41 }
 0x8f3   :  { %3762 = vrcp.f32 %v3059_v47 }
 0x900   :  { %v3763_v48 = vpop.eup %3762 }
 0x901   :  { %v3061_v49 = vmul.f32 %v3763_v48, %v3041_v46 }
 0x903   :  { %3062 = vst [vmem:[#allocation14] sm:$0xff] %v3061_v49 }
 0x904   :  { %3875 = shalt.err (!%p3872_p1)
}
 0x905   :  { %3084 = dma.vmem_to_hbm [thread:$0]  %s3082_s26, 128, %s4552_s6, [#allocation15]  }
 0x906   :  { %3890 = dma.done.wait [#allocation7], 1024  }
 0x907   :  { %3891 = vsyncadd [#allocation7], 4294966272 }
 0x908   :  { %3892 = dma.done.wait [#allocation15], 128  }
 0x909   :  { %3893 = vsyncadd [#allocation15], 4294967168 }
 0x90a   :  { %3091 = vsyncpa [#allocation6], 1 }
 0x90b   :  { %3092 = vsyncpa [#allocation9], 1 }
 0x90c   :  { %3093 = vsyncpa [#allocation12], 1 }
 0x90d   :  { %3094 = vsyncpa [#allocation7], 1 }
 0x90e   :  { %3095 = vsyncpa [#allocation15], 1 }

</bundles_post_ra>
